<compile_context>
chip_gen: v5e
topology: v5e:2x2
jax: 0.10.0
libtpu: 0.0.40
codegen_flags: <defaults>
</compile_context>

<pallas_src>
import functools

import jax
import jax.numpy as jnp
from jax.experimental import pallas as pl
from jax.experimental.pallas import tpu as pltpu

VGG_CFG = [64, 64, 'M', 128, 128, 'M', 256, 256, 256, 'M',
           512, 512, 512, 'M', 512, 512, 512, 'M']
BN_EPS = 1e-5


@functools.lru_cache(maxsize=None)
def _hw_budget():
    """(vmem_limit_bytes, row_tile) per TPU generation."""
    try:
        cap = int(pltpu.get_tpu_info().vmem_capacity_bytes)
    except Exception:
        cap = 128 * 1024 * 1024
    if cap <= 64 * 1024 * 1024:            # v7x-class: 64 MiB physical per TC
        return 44 * 1024 * 1024, 16
    return 96 * 1024 * 1024, 32            # v5e / v6e: 128 MiB physical


def _pick_tile_h(h, pool, avg_pool, row_tile):
    """Largest divisor of h that is <= row_tile (and even when pooling)."""
    if avg_pool:
        return h
    for d in range(min(row_tile, h), 0, -1):
        if h % d == 0 and (not pool or d % 2 == 0):
            return d
    return h


def _round_up(v, m):
    return (v + m - 1) // m * m


# ---------------------------------------------------------------------------
# Fused conv3x3 + BN + ReLU (+ maxpool2x2) (+ global avgpool) kernel
# ---------------------------------------------------------------------------

def _vgg_stage_kernel(x_ref, w_ref, scale_ref, shift_ref, o_ref, *,
                      tile_h, width, cin, pool, avg_pool, n_row_tiles, conv):
    # x_ref:     conv: (1, H, W, Cin) full image (bf16), row windows sliced here
    #            matmul (first layer): (1, TH, W, K) pre-im2col'd row tile
    # w_ref:     (9*Cin, TC) or (K, TC) bf16 weight block
    # scale_ref: (1, TC) f32 folded BN scale
    # shift_ref: (1, TC) f32 folded BN shift (+ conv bias)
    # o_ref:     (1, TH', W', TC) bf16   or (1, 1, TC) f32 when avg_pool
    dt = x_ref.dtype
    tc = scale_ref.shape[-1]

    if conv:
        # ---- row tile + 1-row halo: outer-axis slices (no relayout) ---------
        tt = pl.program_id(2)
        h_total = x_ref.shape[1]
        r0 = tt * tile_h
        if tile_h % 8 == 0:                       # only emit a TRUE alignment hint
            r0 = pl.multiple_of(r0, 8)
        body = x_ref[0, pl.ds(r0, tile_h), :, :]                       # (TH, W, Cin)
        top = x_ref[0, pl.ds(jnp.maximum(r0 - 1, 0), 1), :, :]         # (1,  W, Cin)
        bot = x_ref[0, pl.ds(jnp.minimum(r0 + tile_h, h_total - 1), 1), :, :]
        top = jnp.where(tt == 0, jnp.zeros_like(top), top)
        bot = jnp.where(tt == n_row_tiles - 1, jnp.zeros_like(bot), bot)
        rows = jnp.concatenate([top, body, bot], axis=0)               # (TH+2, W, Cin)

        # ---- zero width pad (padding=1) --------------------------------------
        zcol = jnp.zeros((tile_h + 2, 1, cin), dt)
        xp = jnp.concatenate([zcol, rows, zcol], axis=1)               # (TH+2, W+2, Cin)

        # ---- tap-wise MXU accumulation (no 9*Cin im2col patch) ---------------
        acc = jnp.zeros((tile_h * width, tc), jnp.float32)
        if cin <= 128:
            # per-dy grouping keeps MXU K >= 192 for the narrow-channel stages
            for dy in range(3):
                a = jnp.concatenate(
                    [xp[dy:dy + tile_h, dx:dx + width, :].reshape(tile_h * width, cin)
                     for dx in range(3)], axis=-1)                     # (TH*W, 3*Cin)
                acc += jnp.dot(a, w_ref[pl.ds(dy * 3 * cin, 3 * cin), :],
                               preferred_element_type=jnp.float32)
        else:
            # per-tap accumulation: 9 K=Cin matmuls, minimal scratch
            for dy in range(3):
                for dx in range(3):
                    a = xp[dy:dy + tile_h, dx:dx + width, :].reshape(
                        tile_h * width, cin)
                    acc += jnp.dot(a, w_ref[pl.ds((dy * 3 + dx) * cin, cin), :],
                                   preferred_element_type=jnp.float32)
    else:
        # pre-im2col'd first layer: one plain matmul per row tile
        a = x_ref[0].reshape(tile_h * width, cin)
        acc = jnp.dot(a, w_ref[...], preferred_element_type=jnp.float32)

    # ---- folded BatchNorm + ReLU (f32 epilogue) ------------------------------
    y = jnp.maximum(acc * scale_ref[0] + shift_ref[0], 0.0)
    y = y.reshape(tile_h, width, tc)

    # ---- fused 2x2 max-pool --------------------------------------------------
    if pool:
        y = y.reshape(tile_h // 2, 2, width, tc)
        y = jnp.maximum(y[:, 0], y[:, 1])
        y = y.reshape(tile_h // 2, width // 2, 2, tc)
        y = jnp.maximum(y[:, :, 0, :], y[:, :, 1, :])

    # ---- fused global average pool (AdaptiveAvgPool2d((1,1)) + flatten) ------
    if avg_pool:
        o_ref[0, 0, :] = jnp.mean(y.reshape(-1, tc), axis=0).astype(o_ref.dtype)
    else:
        o_ref[0] = y.astype(o_ref.dtype)


def vgg_stage(x, w, scale, shift, *, pool, avg_pool, conv):
    """One fused VGG stage.  x: (N, H, W, Cin) bf16."""
    n, h, width, cin = x.shape
    cout = scale.shape[-1]
    if conv:
        assert w.shape == (9 * cin, cout), (w.shape, cin, cout)
    else:
        assert w.shape == (cin, cout), (w.shape, cin, cout)
    if pool:
        assert h % 2 == 0 and width % 2 == 0, "spatial dims must be even for pool"

    vmem_limit, row_tile = _hw_budget()

    # Cout blocking: 256-wide lane-dense blocks on the 512-channel layers.
    tc = 256 if cout % 256 == 0 else cout
    n_c = cout // tc

    tile_h = _pick_tile_h(h, pool, avg_pool, row_tile)
    n_t = h // tile_h

    h_out = h // 2 if pool else h
    w_out = width // 2 if pool else width
    tile_h_out = tile_h // 2 if pool else tile_h

    kernel = functools.partial(
        _vgg_stage_kernel, tile_h=tile_h, width=width, cin=cin, pool=pool,
        avg_pool=avg_pool, n_row_tiles=n_t, conv=conv)

    if conv:
        # whole image stays VMEM-resident (fetched once per batch element);
        # row windows + halo are free outer-axis slices inside the kernel.
        x_spec = pl.BlockSpec((1, h, width, cin), lambda cc, nn, tt: (nn, 0, 0, 0))
    else:
        # first (pre-im2col'd) layer: plain row-tiled pipelining, no halo needed.
        x_spec = pl.BlockSpec((1, tile_h, width, cin), lambda cc, nn, tt: (nn, tt, 0, 0))

    in_specs = [
        x_spec,
        pl.BlockSpec((w.shape[0], tc), lambda cc, nn, tt: (0, cc)),
        pl.BlockSpec((1, tc), lambda cc, nn, tt: (0, cc)),
        pl.BlockSpec((1, tc), lambda cc, nn, tt: (0, cc)),
    ]
    if avg_pool:
        out_shape = jax.ShapeDtypeStruct((n, 1, cout), jnp.float32)
        out_specs = pl.BlockSpec((1, 1, tc), lambda cc, nn, tt: (nn, 0, cc))
        out_bytes = n * cout * 4
    else:
        out_shape = jax.ShapeDtypeStruct((n, h_out, w_out, cout), jnp.bfloat16)
        out_specs = pl.BlockSpec((1, tile_h_out, w_out, tc),
                                 lambda cc, nn, tt: (nn, tt, 0, cc))
        out_bytes = n * h_out * w_out * cout * 2

    flops = 2 * n * h * width * w.shape[0] * cout
    bytes_accessed = (x.size * x.dtype.itemsize + w.size * w.dtype.itemsize
                      + scale.size * 4 + shift.size * 4 + out_bytes)

    out = pl.pallas_call(
        kernel,
        out_shape=out_shape,
        # cout-block axis outermost: each weight block is DMA'd once and reused
        # across batch elements / row tiles; row-tile axis innermost.
        grid=(n_c, n, n_t),
        in_specs=in_specs,
        out_specs=out_specs,
        compiler_params=pltpu.CompilerParams(
            dimension_semantics=("parallel", "parallel", "parallel"),
            vmem_limit_bytes=vmem_limit),
        cost_estimate=pl.CostEstimate(flops=flops, transcendentals=0,
                                      bytes_accessed=bytes_accessed),
    )(x, w, scale, shift)

    if avg_pool:
        out = out.reshape(n, cout)
    return out


# ---------------------------------------------------------------------------
# First-layer im2col (Cin=3 is pure lane-padding waste inside the kernel)
# ---------------------------------------------------------------------------

def im2col_3x3(x, k_pad):
    """3x3/pad-1 im2col done by XLA for the Cin=3 input layer; K padded to a
    lane-friendlier multiple of 32."""
    n, h, w, c = x.shape
    xp = jnp.pad(x, ((0, 0), (1, 1), (1, 1), (0, 0)))
    taps = [xp[:, dy:dy + h, dx:dx + w, :] for dy in range(3) for dx in range(3)]
    p = jnp.concatenate(taps, axis=-1)                       # (N, H, W, 9*C)
    if k_pad > 9 * c:
        p = jnp.pad(p, ((0, 0), (0, 0), (0, 0), (0, k_pad - 9 * c)))
    return p


# ---------------------------------------------------------------------------
# Parameter init (deterministic, mirrors VGG16Encoder.__init__ shapes)
# ---------------------------------------------------------------------------

def init_vgg16_params(key, in_channels=3):
    """Kaiming-normal (fan_out, relu) conv weights, zero bias; BN gamma=1 /
    beta=0 / running stats folded into per-channel f32 (scale, shift).
    Each 'M' in the config is fused into the preceding conv stage."""
    stages = []
    for v in VGG_CFG:
        if v == 'M':
            cout, _ = stages[-1]
            stages[-1] = (cout, True)
        else:
            stages.append((int(v), False))

    params = []
    cin = in_channels
    for idx, (cout, pool) in enumerate(stages):
        key, wk = jax.random.split(key)
        fan_out = cout * 9
        std = (2.0 / fan_out) ** 0.5
        w = jax.random.normal(wk, (3, 3, cin, cout), jnp.float32) * std
        bias = jnp.zeros((cout,), jnp.float32)
        gamma = jnp.ones((cout,), jnp.float32)
        beta = jnp.zeros((cout,), jnp.float32)
        run_mean = jnp.zeros((cout,), jnp.float32)
        run_var = jnp.ones((cout,), jnp.float32)
        scale = gamma / jnp.sqrt(run_var + BN_EPS)
        shift = beta + (bias - run_mean) * scale

        wmat = w.reshape(9 * cin, cout)                      # (dy, dx, cin) major
        k_im2col = None
        if idx == 0:
            k_im2col = _round_up(9 * cin, 32)
            wmat = jnp.pad(wmat, ((0, k_im2col - 9 * cin), (0, 0)))
        params.append(dict(w=wmat.astype(jnp.bfloat16),
                           scale=scale.reshape(1, cout),
                           shift=shift.reshape(1, cout),
                           pool=pool, conv=(idx != 0), k_im2col=k_im2col))
        cin = cout
    return params


def vgg16_encoder_forward(x_nchw, params):
    """x_nchw: (N, C, H, W) float -> embeddings (N, 512) float32."""
    x = jnp.transpose(x_nchw, (0, 2, 3, 1)).astype(jnp.bfloat16)   # NCHW -> NHWC
    x = im2col_3x3(x, params[0]['k_im2col'])                       # first layer patches
    n_stages = len(params)
    for i, p in enumerate(params):
        x = vgg_stage(x, p['w'], p['scale'], p['shift'],
                      pool=p['pool'], avg_pool=(i == n_stages - 1), conv=p['conv'])
    return x                                                        # (N, 512)


# ---------------------------------------------------------------------------

if __name__ == "__main__":
    key = jax.random.PRNGKey(0)
    pkey, xkey = jax.random.split(key)

    # Small input consistent with the module: 5 maxpools => spatial 32 -> 1.
    x = jax.random.normal(xkey, (2, 3, 32, 32), jnp.float32)        # NCHW
    params = init_vgg16_params(pkey, in_channels=3)

    out = vgg16_encoder_forward(x, params)
    out = jax.block_until_ready(out)

    assert out.shape == (2, 512), out.shape
    assert bool(jnp.all(jnp.isfinite(out)))
    print("KERNEL_OK")
</pallas_src>

<mosaic_0001>
module attributes {stable_mosaic.version = 11 : i64} {
  func.func @_vgg_stage_kernel(%arg0: i32, %arg1: i32, %arg2: i32, %arg3: memref<1x32x32x32xbf16, #tpu.memory_space<vmem>>, %arg4: memref<32x64xbf16, #tpu.memory_space<vmem>>, %arg5: memref<1x64xf32, #tpu.memory_space<vmem>>, %arg6: memref<1x64xf32, #tpu.memory_space<vmem>>, %arg7: memref<1x32x32x64xbf16, #tpu.memory_space<vmem>>) attributes {dimension_semantics = [#tpu.dimension_semantics<parallel>, #tpu.dimension_semantics<parallel>, #tpu.dimension_semantics<parallel>], iteration_bounds = array<i64: 1, 2, 1>, scalar_prefetch = 0 : i64, scratch_operands = 0 : i64, tpu.core_type = #tpu.core_type<tc>, window_params = [{transform_indices = @transform_0, window_bounds = array<i64: 1, 32, 32, 32>}, {transform_indices = @transform_1, window_bounds = array<i64: 32, 64>}, {transform_indices = @transform_2, window_bounds = array<i64: 1, 64>}, {transform_indices = @transform_3, window_bounds = array<i64: 1, 64>}, {transform_indices = @transform_4, window_bounds = array<i64: 1, 32, 32, 64>}]} {
    %c0 = arith.constant 0 : index
    %c0_0 = arith.constant 0 : index
    %c0_1 = arith.constant 0 : index
    %c0_2 = arith.constant 0 : index
    %0 = vector.load %arg3[%c0, %c0_0, %c0_1, %c0_2] : memref<1x32x32x32xbf16, #tpu.memory_space<vmem>>, vector<1x32x32x32xbf16>
    %1 = vector.shape_cast %0 : vector<1x32x32x32xbf16> to vector<32x32x32xbf16>
    %2 = vector.shape_cast %1 : vector<32x32x32xbf16> to vector<1024x32xbf16>
    %c0_3 = arith.constant 0 : index
    %c0_4 = arith.constant 0 : index
    %3 = vector.load %arg4[%c0_3, %c0_4] : memref<32x64xbf16, #tpu.memory_space<vmem>>, vector<32x64xbf16>
    %cst = arith.constant dense<0.000000e+00> : vector<1024x64xf32>
    %4 = tpu.matmul %2, %3, %cst {dimension_numbers = #tpu.dot_dimension_numbers<[1], [0], [0], [1], [0, 0, 1, 1], [], []>} : vector<1024x32xbf16>, vector<32x64xbf16>, vector<1024x64xf32> -> vector<1024x64xf32>
    %c0_5 = arith.constant 0 : index
    %c0_6 = arith.constant 0 : index
    %5 = vector.load %arg5[%c0_5, %c0_6] : memref<1x64xf32, #tpu.memory_space<vmem>>, vector<1x64xf32>
    %6 = vector.shape_cast %5 : vector<1x64xf32> to vector<64xf32>
    %7 = vector.shape_cast %6 : vector<64xf32> to vector<1x64xf32>
    %8 = vector.broadcast %7 : vector<1x64xf32> to vector<1024x64xf32>
    %9 = arith.mulf %4, %8 : vector<1024x64xf32>
    %c0_7 = arith.constant 0 : index
    %c0_8 = arith.constant 0 : index
    %10 = vector.load %arg6[%c0_7, %c0_8] : memref<1x64xf32, #tpu.memory_space<vmem>>, vector<1x64xf32>
    %11 = vector.shape_cast %10 : vector<1x64xf32> to vector<64xf32>
    %12 = vector.shape_cast %11 : vector<64xf32> to vector<1x64xf32>
    %13 = vector.broadcast %12 : vector<1x64xf32> to vector<1024x64xf32>
    %14 = arith.addf %9, %13 : vector<1024x64xf32>
    %cst_9 = arith.constant 0.000000e+00 : f32
    %15 = vector.broadcast %cst_9 : f32 to vector<1024x64xf32>
    %16 = arith.maximumf %14, %15 : vector<1024x64xf32>
    %17 = vector.shape_cast %16 : vector<1024x64xf32> to vector<32x32x64xf32>
    %18 = arith.truncf %17 : vector<32x32x64xf32> to vector<32x32x64xbf16>
    %c0_10 = arith.constant 0 : index
    %c0_11 = arith.constant 0 : index
    %c0_12 = arith.constant 0 : index
    %c0_13 = arith.constant 0 : index
    %19 = vector.load %arg7[%c0_10, %c0_11, %c0_12, %c0_13] : memref<1x32x32x64xbf16, #tpu.memory_space<vmem>>, vector<1x32x32x64xbf16>
    %20 = vector.shape_cast %19 : vector<1x32x32x64xbf16> to vector<32x32x64xbf16>
    %21 = vector.shape_cast %18 : vector<32x32x64xbf16> to vector<1x32x32x64xbf16>
    tpu.vector_store %arg7[%c0_10, %c0_11, %c0_12, %c0_13], %21 {strides = array<i32>} : memref<1x32x32x64xbf16, #tpu.memory_space<vmem>>, vector<1x32x32x64xbf16>,
    return
  }
  func.func @transform_0(%arg0: i32, %arg1: i32, %arg2: i32) -> (i32, i32, i32, i32) {
    %c0_i32 = arith.constant 0 : i32
    %c0_i32_0 = arith.constant 0 : i32
    %c0_i32_1 = arith.constant 0 : i32
    return %arg1, %arg2, %c0_i32, %c0_i32_0 : i32, i32, i32, i32
  }
  func.func @transform_1(%arg0: i32, %arg1: i32, %arg2: i32) -> (i32, i32) {
    %c0_i32 = arith.constant 0 : i32
    %c0_i32_0 = arith.constant 0 : i32
    return %c0_i32, %arg0 : i32, i32
  }
  func.func @transform_2(%arg0: i32, %arg1: i32, %arg2: i32) -> (i32, i32) {
    %c0_i32 = arith.constant 0 : i32
    %c0_i32_0 = arith.constant 0 : i32
    return %c0_i32, %arg0 : i32, i32
  }
  func.func @transform_3(%arg0: i32, %arg1: i32, %arg2: i32) -> (i32, i32) {
    %c0_i32 = arith.constant 0 : i32
    %c0_i32_0 = arith.constant 0 : i32
    return %c0_i32, %arg0 : i32, i32
  }
  func.func @transform_4(%arg0: i32, %arg1: i32, %arg2: i32) -> (i32, i32, i32, i32) {
    %c0_i32 = arith.constant 0 : i32
    %c0_i32_0 = arith.constant 0 : i32
    return %arg1, %arg2, %c0_i32, %arg0 : i32, i32, i32, i32
  }
}

</mosaic_0001>

<bundles_post_ra>
// kernel: tpu_custom_call.1
= control target key start
LH: loop header
LB: loop body
LE: loop exit
PB: predicated region body
PF: predicated region fallthrough
CT: control target
= control target key end

     0   :  { %s3587_s0 = inlined_call_operand.hbm [shape: bf16[2,32,32,32], index: 0, kind: input, shape index: {}]   ;;  %s3588_s1 = inlined_call_operand.hbm [shape: bf16[32,64], index: 1, kind: input, shape index: {}]   ;;  %s3589_s2 = inlined_call_operand.vmem [shape: f32[1,64], index: 2, kind: input, shape index: {}]   ;;  %s3590_s3 = inlined_call_operand.vmem [shape: f32[1,64], index: 3, kind: input, shape index: {}]   ;;  %s3591_s4 = inlined_call_operand.hbm [shape: bf16[2,32,32,64], index: 4, kind: output, shape index: {}]  }
   0x1   :  { %3595 = sst [smem:[#allocation12_spill]] %s3588_s1 }
   0x2   :  { %9 = vsyncpa [#allocation3], 0 }
   0x3   :  { %11 = vsyncpa [#allocation3 + $0x1], 0 }
   0x4   :  { %12 = vsyncpa [#allocation6], 0 }
   0x5   :  { %13 = vsyncpa [#allocation4], 0 }
   0x6   :  { %15 = vsyncpa [#allocation4 + $0x1], 0  ;;  %s2763_s15 = smov 0   ;;  %s2765_s16 = smov 0  }
   0x7   :  { %s2767_s17 = smov 0   ;;  %s2769_s18 = smov 0  }
   0x8   :  { %s2771_s19 = smov 0   ;;  %s2773_s20 = smov 0  }
   0x9 LB: > { %s2083_s21 = sadd.s32 4294967295, %s2731_s20   ;;  %s2084_s22 = sadd.s32 4294967294, %s2731_s20   ;;  %s2731_s20 = sphi %s2773_s20, %s21_s20   ;;  %s2727_s19 = sphi %s2771_s19, %s3612_s19   ;;  %s2723_s18 = sphi %s2769_s18, %s3611_s18   ;;  %s2719_s17 = sphi %s2767_s17, %s3610_s17   ;;  %s2715_s16 = sphi %s2765_s16, %s3609_s16   ;;  %s2711_s15 = sphi %s2763_s15, %s3608_s15  }
   0xa   : > { %p62_p0 = scmp.ne.s32.totalorder %s2715_s16, %s2711_s15  ;;  %p2797_p1 = scmp.eq.s32.totalorder %s2083_s21, 0 }
   0xb   : > { %p2801_p2 = scmp.eq.s32.totalorder %s2083_s21, 1  ;;  %p174_p3 = scmp.eq.s32.totalorder %s2084_s22, 1 }
   0xc   : > { %p2807_p4 = por %p2797_p1, %p62_p0  ;;  %p2085_p5 = scmp.ge.s32.totalorder %s2731_s20, 1 }
   0xd   : > { %p2812_p6 = por %p174_p3, %p62_p0  ;;  %p181_p7 = scmp.lt.s32.totalorder %s2731_s20, 3 }
   0xe   : > { %s3600_s1 = sld [smem:[#allocation12_spill]]  ;;  %s2733_s5 = smov [#allocation5]  }
   0xf   : > { %p2820_p8 = pnand %p2085_p5, %p181_p7  ;;  %s196_s6 = sshll.u32 %s2733_s5, 4  ;;  %s197_s6 = int_to_ptr.vmem [resolvable:$true] %s196_s6 }
  0x10   : > { %p2089_p11 = scmp.ge.s32.totalorder %s2731_s20, 2  ;;  %s3592_s7 = smov 64  }
  0x11   : > { %p2512_p9 = pneg %p2820_p8  ;;  %s3593_s8 = smov 4  }
  0x12   : > { %s36_s9 = sadd.s32 1, %s2727_s19  ;;  %s49_s10 = sadd.s32 1, %s2719_s17 }
  0x13   : > { %p2513_p10 = pnand %p2512_p9, %p2797_p1  ;;  %p38_p12 = scmp.ge.s32.totalorder %s36_s9, 2 }
  0x14   : > { %s194_s29 = sshll.u32 %s3600_s1, 4  ;;  %p56_p13 = scmp.ne.s32.totalorder %s2719_s17, %s2715_s16  ;;  %s195_s29 = int_to_ptr.hbm [resolvable:$true] %s194_s29 }
  0x15   : > { %2515 = dma.hbm_to_vmem [thread:$0]  (!%p2513_p10), %s195_s29, 256, %s197_s6, [#allocation6], %s3592_s7, %s3592_s7, %s3593_s8  }
  0x16   : > { %p57_p0 = scmp.eq.s32.totalorder %s2731_s20, 0  ;;  %s3614_s9 = smov (%p38_p12, %s36_s9), 0 }
  0x17   : > { %3602 = sst [smem:[#allocation11_spill]] %s3614_s9  ;;  %p2845_p5 = por %p2801_p2, %p56_p13 }
  0x18   : > { %p2839_p3 = por %p57_p0, %p56_p13  ;;  %s44_s13 = ssub.s32 %s2727_s19, %s3614_s9 }
  0x19   : > { %p2525_p7 = scmp.lt.s32.totalorder %s2731_s20, 2  ;;  %p47_p9 = scmp.eq.s32.totalorder %s44_s13, 0 }
  0x1a   : > { %s222_s14 = sand.u32 1, %s2719_s17   ;;  %s2430_s27 = sshll.u32 %s2727_s19, 9 }
  0x1b   : > { %s2090_s21 = sshll.u32 %s222_s14, 9  ;;  %s234_s5 = scalar_lea.hbm %s3587_s0, %s2430_s27 }
  0x1c   : > { %s2854_s22 = scalar_select %p47_p9, %s2719_s17, %s49_s10  }
  0x1d   : > { %s226_s6 = scalar_lea.vmem [#allocation2], %s2090_s21  ;;  %s235_s24 = sshll.u32 %s234_s5, 4  ;;  %s236_s24 = int_to_ptr.hbm [resolvable:$true] %s235_s24 }
  0x1e   : > { %s237_s7 = sshll.u32 %s226_s6, 4  ;;  %p2517_p2 = pnand %p2525_p7, %p2839_p3  ;;  %s238_s7 = int_to_ptr.vmem [resolvable:$true] %s237_s7 }
  0x1f   : > { %s223_s8 = scalar_lea.sflag [#allocation3], %s222_s14  ;;  %s3605_s1 = smov 4  }
  0x20   : > { %s3606_s9 = smov 64   ;;  %249 = sbr.rel (%p2820_p8) target bundleno = 442 (0x1ba), region = 36 }
  0x21   : > { %2519 = dma.hbm_to_vmem [thread:$0]  (!%p2517_p2), %s236_s24, 8192, %s238_s7, %s223_s8, %s3606_s9, %s3606_s9, %s3605_s1  }
  0x22   : > { %s2868_s10 = sand.u32 (!%p2820_p8), 1, %s2715_s16  }
  0x23   : > { %s2094_s13 = sshll.u32 (!%p2820_p8), %s2868_s10, 9  ;;  %s252_s21 = scalar_lea.sflag (!%p2820_p8), [#allocation3], %s2868_s10 }
  0x24   : > { %s2874_s11 = scalar_lea.vmem (!%p2820_p8), [#allocation2], %s2094_s13 }
  0x25   : > { %2698 = dma.done.wait (%p2807_p4), %s252_s21, 8192  }
  0x26   : > { %2700 = vsyncadd (%p2807_p4), %s252_s21, 4294959104 }
  0x27   : > { %2702 = dma.done.wait (%p2797_p1), [#allocation6], 256  }
  0x28   : > { %2704 = vsyncadd (%p2797_p1), [#allocation6], 4294967040  ;;  %v2496_v0 = vld [vmem:[#allocation5 + $0x8] sm:$0xff]  ;;  %v2495_v1 = vld [vmem:[#allocation5] sm:$0xff]  ;;  %vm765_vm0 = vcmask 261120   ;;  %vm1807_vm1 = vcmask 519168  }
  0x29   : > { %964 = vmatpush.bf16.msra.mxu0 %v2496_v0  ;;  %2498 = vmatpush.bf16.msra.mxu1 %v2496_v0  ;;  %v2431_v2 = vld [vmem:[%s2874_s11] sm:$0xff]  ;;  %v2432_v6 = vld [vmem:[%s2874_s11 + $0x8] sm:$0xff]  ;;  %v2433_v10 = vld [vmem:[%s2874_s11 + $0x10] sm:$0xff]  ;;  %s2974_s7 = scalar_lea.vmem [#allocation7], %s2094_s13  ;;  %s2497_s28 = sshll.u32 %s2723_s18, 9 }
  0x2a   : > { %2499 = vmatpush.bf16.msra.mxu2 %v2496_v0  ;;  %2500 = vmatpush.bf16.msra.mxu3 %v2496_v0  ;;  %v2447_v3 = vld [vmem:[%s2874_s11 + $0x80] sm:$0xff]  ;;  %v2448_v7 = vld [vmem:[%s2874_s11 + $0x88] sm:$0xff]  ;;  %v2449_v11 = vld [vmem:[%s2874_s11 + $0x90] sm:$0xff]  ;;  %s1952_s6 = scalar_lea.hbm %s3591_s4, %s2497_s28  ;;  %s1953_s18 = sshll.u32 %s2974_s7, 4  ;;  %s1954_s18 = int_to_ptr.vmem [resolvable:$true] %s1953_s18 }
  0x2b   : > { %v2463_v4 = vld [vmem:[%s2874_s11 + $0x100] sm:$0xff]  ;;  %v2464_v8 = vld [vmem:[%s2874_s11 + $0x108] sm:$0xff]  ;;  %v2465_v12 = vld [vmem:[%s2874_s11 + $0x110] sm:$0xff]  ;;  %s1955_s24 = sshll.u32 %s1952_s6, 4  ;;  %s1937_s13 = scalar_lea.sflag [#allocation4], %s2868_s10  ;;  %s1956_s24 = int_to_ptr.hbm [resolvable:$true] %s1955_s24 }
  0x2c   : > { %v2479_v5 = vld [vmem:[%s2874_s11 + $0x180] sm:$0xff]  ;;  %v2480_v9 = vld [vmem:[%s2874_s11 + $0x188] sm:$0xff]  ;;  %v2481_v13 = vld [vmem:[%s2874_s11 + $0x190] sm:$0xff]  ;;  %s2659_s21 = sshra.s32 %s1956_s24, 4  ;;  %s2665_s25 = scalar_lea.hbm %s3591_s4, 1024  ;;  %s2660_s21 = int_to_ptr.hbm [resolvable:$true] %s2659_s21 }
  0x2d   : > { %965 = vmatpush.bf16.msra.mxu0 %v2495_v1  ;;  %2501 = vmatpush.bf16.msra.mxu1 %v2495_v1  ;;  %v2434_v14 = vld [vmem:[%s2874_s11 + $0x18] sm:$0xff]  ;;  %v2435_v18 = vld [vmem:[%s2874_s11 + $0x20] sm:$0xff]  ;;  %v2436_v22 = vld [vmem:[%s2874_s11 + $0x28] sm:$0xff]  ;;  %p2666_p10 = scmp.lt.s32.totalorder %s2660_s21, %s3591_s4 }
  0x2e   : > { %2502 = vmatpush.bf16.msra.mxu2 %v2495_v1  ;;  %2503 = vmatpush.bf16.msra.mxu3 %v2495_v1  ;;  %v2450_v15 = vld [vmem:[%s2874_s11 + $0x98] sm:$0xff]  ;;  %v2451_v19 = vld [vmem:[%s2874_s11 + $0xa0] sm:$0xff]  ;;  %v2452_v23 = vld [vmem:[%s2874_s11 + $0xa8] sm:$0xff] }
  0x2f   : > { %v2466_v16 = vld [vmem:[%s2874_s11 + $0x118] sm:$0xff]  ;;  %v2467_v20 = vld [vmem:[%s2874_s11 + $0x120] sm:$0xff]  ;;  %v2468_v24 = vld [vmem:[%s2874_s11 + $0x128] sm:$0xff] }
  0x30   : > { %2361 = vmatmul.msk.bf16.vlgmr.msra.gmra.mxu0 %vm765_vm0, %v2431_v2  ;;  %2377 = vmatmul.msk.bf16.vlgmr.msra.gmra.mxu1 %vm765_vm0, %v2447_v3  ;;  %v2482_v17 = vld [vmem:[%s2874_s11 + $0x198] sm:$0xff]  ;;  %v2483_v21 = vld [vmem:[%s2874_s11 + $0x1a0] sm:$0xff]  ;;  %v2484_v25 = vld [vmem:[%s2874_s11 + $0x1a8] sm:$0xff] }
  0x31   : > { %2393 = vmatmul.msk.bf16.vlgmr.msra.gmra.mxu2 %vm765_vm0, %v2463_v4  ;;  %2409 = vmatmul.msk.bf16.vlgmr.msra.gmra.mxu3 %vm765_vm0, %v2479_v5  ;;  %v2437_v26 = vld [vmem:[%s2874_s11 + $0x30] sm:$0xff]  ;;  %v2438_v30 = vld [vmem:[%s2874_s11 + $0x38] sm:$0xff]  ;;  %v2951_v34 = vld [vmem:[%s3589_s2] ss:$0 sm:$0xff] }
  0x32   : > { %v2453_v27 = vld [vmem:[%s2874_s11 + $0xb0] sm:$0xff]  ;;  %v2454_v31 = vld [vmem:[%s2874_s11 + $0xb8] sm:$0xff]  ;;  %v2956_v35 = vld [vmem:[%s3590_s3] ss:$0 sm:$0xff] }
  0x33   : > { %v2469_v28 = vld [vmem:[%s2874_s11 + $0x130] sm:$0xff]  ;;  %v2470_v32 = vld [vmem:[%s2874_s11 + $0x138] sm:$0xff]  ;;  %v2439_v36 = vld [vmem:[%s2874_s11 + $0x40] sm:$0xff] }
  0x34   : > { %v2485_v29 = vld [vmem:[%s2874_s11 + $0x1b0] sm:$0xff]  ;;  %v2486_v33 = vld [vmem:[%s2874_s11 + $0x1b8] sm:$0xff]  ;;  %v2455_v37 = vld [vmem:[%s2874_s11 + $0xc0] sm:$0xff] }
  0x35   : > { %v2471_v40 = vld [vmem:[%s2874_s11 + $0x140] sm:$0xff] }
  0x36   : > { %v2487_v41 = vld [vmem:[%s2874_s11 + $0x1c0] sm:$0xff] }
  0x40   : > { %2362 = vmatmul.msk.bf16.gmra.mxu0 %vm765_vm0, %v2432_v6  ;;  %2378 = vmatmul.msk.bf16.gmra.mxu1 %vm765_vm0, %v2448_v7 }
  0x41   : > { %2394 = vmatmul.msk.bf16.gmra.mxu2 %vm765_vm0, %v2464_v8  ;;  %2410 = vmatmul.msk.bf16.gmra.mxu3 %vm765_vm0, %v2480_v9  ;;  %v2440_v8 = vld [vmem:[%s2874_s11 + $0x48] sm:$0xff] }
  0x42   : > { %v2456_v9 = vld [vmem:[%s2874_s11 + $0xc8] sm:$0xff] }
  0x50   : > { %2363 = vmatmul.msk.bf16.gmra.mxu0 %vm765_vm0, %v2433_v10  ;;  %2379 = vmatmul.msk.bf16.gmra.mxu1 %vm765_vm0, %v2449_v11 }
  0x51   : > { %2395 = vmatmul.msk.bf16.gmra.mxu2 %vm765_vm0, %v2465_v12  ;;  %2411 = vmatmul.msk.bf16.gmra.mxu3 %vm765_vm0, %v2481_v13 }
  0x60   : > { %2364 = vmatmul.msk.bf16.gmra.mxu0 %vm765_vm0, %v2434_v14  ;;  %2380 = vmatmul.msk.bf16.gmra.mxu1 %vm765_vm0, %v2450_v15  ;;  %v2472_v14 = vld [vmem:[%s2874_s11 + $0x148] sm:$0xff] }
  0x61   : > { %2396 = vmatmul.msk.bf16.gmra.mxu2 %vm765_vm0, %v2466_v16  ;;  %2412 = vmatmul.msk.bf16.gmra.mxu3 %vm765_vm0, %v2482_v17  ;;  %v2488_v15 = vld [vmem:[%s2874_s11 + $0x1c8] sm:$0xff] }
  0x70   : > { %2365 = vmatmul.msk.bf16.gmra.mxu0 %vm765_vm0, %v2435_v18  ;;  %2381 = vmatmul.msk.bf16.gmra.mxu1 %vm765_vm0, %v2451_v19 }
  0x71   : > { %2397 = vmatmul.msk.bf16.gmra.mxu2 %vm765_vm0, %v2467_v20  ;;  %2413 = vmatmul.msk.bf16.gmra.mxu3 %vm765_vm0, %v2483_v21 }
  0x80   : > { %2366 = vmatmul.msk.bf16.gmra.mxu0 %vm765_vm0, %v2436_v22  ;;  %2382 = vmatmul.msk.bf16.gmra.mxu1 %vm765_vm0, %v2452_v23 }
  0x81   : > { %2398 = vmatmul.msk.bf16.gmra.mxu2 %vm765_vm0, %v2468_v24  ;;  %2414 = vmatmul.msk.bf16.gmra.mxu3 %vm765_vm0, %v2484_v25 }
  0x90   : > { %2367 = vmatmul.msk.bf16.gmra.mxu0 %vm765_vm0, %v2437_v26  ;;  %2383 = vmatmul.msk.bf16.gmra.mxu1 %vm765_vm0, %v2453_v27 }
  0x91   : > { %2399 = vmatmul.msk.bf16.gmra.mxu2 %vm765_vm0, %v2469_v28  ;;  %2415 = vmatmul.msk.bf16.gmra.mxu3 %vm765_vm0, %v2485_v29 }
  0xa0   : > { %2368 = vmatmul.msk.bf16.gmra.mxu0 %vm765_vm0, %v2438_v30  ;;  %2384 = vmatmul.msk.bf16.gmra.mxu1 %vm765_vm0, %v2454_v31 }
  0xa1   : > { %2400 = vmatmul.msk.bf16.gmra.mxu2 %vm765_vm0, %v2470_v32  ;;  %2416 = vmatmul.msk.bf16.gmra.mxu3 %vm765_vm0, %v2486_v33 }
  0xad   : > { %v967_v38 = vpop.f32.mrf.mxu0  ;;  %v1047_v39 = vpop.f32.mrf.mxu1 }
  0xae   : > { %v1291_v42 = vmul.f32 %v2951_v34, %v967_v38  ;;  %v1323_v43 = vmul.f32 %v2951_v34, %v1047_v39 }
  0xb0   : > { %v1423_v44 = vadd.f32 %v2956_v35, %v1291_v42  ;;  %v1455_v45 = vadd.f32 %v2956_v35, %v1323_v43  ;;  %2369 = vmatmul.msk.bf16.gmra.mxu0 %vm765_vm0, %v2439_v36  ;;  %2385 = vmatmul.msk.bf16.gmra.mxu1 %vm765_vm0, %v2455_v37 }
  0xb1   : > { %2401 = vmatmul.msk.bf16.gmra.mxu2 %vm765_vm0, %v2471_v40  ;;  %2417 = vmatmul.msk.bf16.gmra.mxu3 %vm765_vm0, %v2487_v41 }
  0xb2   : > { %v1551_v46 = vmax.f32 %v1423_v44, 0.0  ;;  %v1583_v47 = vmax.f32 %v1455_v45, 0.0 }
  0xb4   : > { %v1679_v48 = vpack.c.bf16 %v1551_v46, %v1551_v46  ;;  %v1711_v49 = vpack.c.bf16 %v1583_v47, %v1583_v47  ;;  %v1127_v50 = vpop.f32.mrf.mxu2  ;;  %v1207_v51 = vpop.f32.mrf.mxu3 }
  0xb5   : > { %v1355_v52 = vmul.f32 %v2951_v34, %v1127_v50  ;;  %v1387_v53 = vmul.f32 %v2951_v34, %v1207_v51  ;;  %v969_v54 = vpop.f32.mrf.mxu0  ;;  %v1049_v55 = vpop.f32.mrf.mxu1 }
  0xb6   : > { %1808 = vst.msk [vmem:[%s2974_s7] sm:$0xf] %vm1807_vm1, %v1679_v48  ;;  %v1292_v56 = vmul.f32 %v2951_v34, %v969_v54  ;;  %v1324_v57 = vmul.f32 %v2951_v34, %v1049_v55  ;;  %v2441_v54 = vld [vmem:[%s2874_s11 + $0x50] sm:$0xff] }
  0xb7   : > { %1840 = vst.msk [vmem:[%s2974_s7 + $0x80] sm:$0xf] %vm1807_vm1, %v1711_v49  ;;  %v1487_v58 = vadd.f32 %v2956_v35, %v1355_v52  ;;  %v1519_v59 = vadd.f32 %v2956_v35, %v1387_v53  ;;  %v2457_v55 = vld [vmem:[%s2874_s11 + $0xd0] sm:$0xff] }
  0xb8   : > { %v1424_v60 = vadd.f32 %v2956_v35, %v1292_v56  ;;  %v1456_v61 = vadd.f32 %v2956_v35, %v1324_v57 }
  0xb9   : > { %v1615_v62 = vmax.f32 %v1487_v58, 0.0  ;;  %v1647_v63 = vmax.f32 %v1519_v59, 0.0 }
  0xba   : > { %v1552_v0 = vmax.f32 %v1424_v60, 0.0  ;;  %v1584_v1 = vmax.f32 %v1456_v61, 0.0  ;;  %v2473_v60 = vld [vmem:[%s2874_s11 + $0x150] sm:$0xff] }
  0xbb   : > { %v1743_v2 = vpack.c.bf16 %v1615_v62, %v1615_v62  ;;  %v1775_v3 = vpack.c.bf16 %v1647_v63, %v1647_v63  ;;  %v2489_v61 = vld [vmem:[%s2874_s11 + $0x1d0] sm:$0xff] }
  0xbc   : > { %v1680_v4 = vpack.c.bf16 %v1552_v0, %v1552_v0  ;;  %v1712_v5 = vpack.c.bf16 %v1584_v1, %v1584_v1  ;;  %v1129_v6 = vpop.f32.mrf.mxu2  ;;  %v1209_v7 = vpop.f32.mrf.mxu3 }
  0xbd   : > { %1872 = vst.msk [vmem:[%s2974_s7 + $0x100] sm:$0xf] %vm1807_vm1, %v1743_v2  ;;  %v1356_v10 = vmul.f32 %v2951_v34, %v1129_v6  ;;  %v1388_v11 = vmul.f32 %v2951_v34, %v1209_v7  ;;  %v972_v12 = vpop.f32.mrf.mxu0  ;;  %v1052_v13 = vpop.f32.mrf.mxu1 }
  0xbe   : > { %1904 = vst.msk [vmem:[%s2974_s7 + $0x180] sm:$0xf] %vm1807_vm1, %v1775_v3  ;;  %v1293_v16 = vmul.f32 %v2951_v34, %v972_v12  ;;  %v1325_v17 = vmul.f32 %v2951_v34, %v1052_v13 }
  0xbf   : > { %1809 = vst.msk [vmem:[%s2974_s7 + $0x4] sm:$0xf] %vm1807_vm1, %v1680_v4  ;;  %v1488_v18 = vadd.f32 %v2956_v35, %v1356_v10  ;;  %v1520_v19 = vadd.f32 %v2956_v35, %v1388_v11 }
  0xc0   : > { %1841 = vst.msk [vmem:[%s2974_s7 + $0x84] sm:$0xf] %vm1807_vm1, %v1712_v5  ;;  %v1425_v20 = vadd.f32 %v2956_v35, %v1293_v16  ;;  %v1457_v21 = vadd.f32 %v2956_v35, %v1325_v17  ;;  %2370 = vmatmul.msk.bf16.gmra.mxu0 %vm765_vm0, %v2440_v8  ;;  %2386 = vmatmul.msk.bf16.gmra.mxu1 %vm765_vm0, %v2456_v9 }
  0xc1   : > { %v1616_v22 = vmax.f32 %v1488_v18, 0.0  ;;  %v1648_v23 = vmax.f32 %v1520_v19, 0.0  ;;  %2402 = vmatmul.msk.bf16.gmra.mxu2 %vm765_vm0, %v2472_v14  ;;  %2418 = vmatmul.msk.bf16.gmra.mxu3 %vm765_vm0, %v2488_v15 }
  0xc2   : > { %v1553_v24 = vmax.f32 %v1425_v20, 0.0  ;;  %v1585_v25 = vmax.f32 %v1457_v21, 0.0 }
  0xc3   : > { %v1744_v26 = vpack.c.bf16 %v1616_v22, %v1616_v22  ;;  %v1776_v27 = vpack.c.bf16 %v1648_v23, %v1648_v23 }
  0xc4   : > { %v1681_v28 = vpack.c.bf16 %v1553_v24, %v1553_v24  ;;  %v1713_v29 = vpack.c.bf16 %v1585_v25, %v1585_v25  ;;  %v1132_v30 = vpop.f32.mrf.mxu2  ;;  %v1212_v31 = vpop.f32.mrf.mxu3 }
  0xc5   : > { %1873 = vst.msk [vmem:[%s2974_s7 + $0x104] sm:$0xf] %vm1807_vm1, %v1744_v26  ;;  %v1357_v32 = vmul.f32 %v2951_v34, %v1132_v30  ;;  %v1389_v33 = vmul.f32 %v2951_v34, %v1212_v31  ;;  %v974_v36 = vpop.f32.mrf.mxu0  ;;  %v1054_v37 = vpop.f32.mrf.mxu1 }
  0xc6   : > { %1905 = vst.msk [vmem:[%s2974_s7 + $0x184] sm:$0xf] %vm1807_vm1, %v1776_v27  ;;  %v1294_v38 = vmul.f32 %v2951_v34, %v974_v36  ;;  %v1326_v39 = vmul.f32 %v2951_v34, %v1054_v37  ;;  %v2442_v36 = vld [vmem:[%s2874_s11 + $0x58] sm:$0xff] }
  0xc7   : > { %1810 = vst.msk [vmem:[%s2974_s7 + $0x8] sm:$0xf] %vm1807_vm1, %v1681_v28  ;;  %v1489_v40 = vadd.f32 %v2956_v35, %v1357_v32  ;;  %v1521_v41 = vadd.f32 %v2956_v35, %v1389_v33  ;;  %v2458_v37 = vld [vmem:[%s2874_s11 + $0xd8] sm:$0xff] }
  0xc8   : > { %1842 = vst.msk [vmem:[%s2974_s7 + $0x88] sm:$0xf] %vm1807_vm1, %v1713_v29  ;;  %v1426_v42 = vadd.f32 %v2956_v35, %v1294_v38  ;;  %v1458_v43 = vadd.f32 %v2956_v35, %v1326_v39 }
  0xc9   : > { %v1617_v44 = vmax.f32 %v1489_v40, 0.0  ;;  %v1649_v45 = vmax.f32 %v1521_v41, 0.0 }
  0xca   : > { %v1554_v46 = vmax.f32 %v1426_v42, 0.0  ;;  %v1586_v47 = vmax.f32 %v1458_v43, 0.0  ;;  %v2474_v42 = vld [vmem:[%s2874_s11 + $0x158] sm:$0xff] }
  0xcb   : > { %v1745_v48 = vpack.c.bf16 %v1617_v44, %v1617_v44  ;;  %v1777_v49 = vpack.c.bf16 %v1649_v45, %v1649_v45  ;;  %v2490_v43 = vld [vmem:[%s2874_s11 + $0x1d8] sm:$0xff] }
  0xcc   : > { %v1682_v50 = vpack.c.bf16 %v1554_v46, %v1554_v46  ;;  %v1714_v51 = vpack.c.bf16 %v1586_v47, %v1586_v47  ;;  %v1134_v52 = vpop.f32.mrf.mxu2  ;;  %v1214_v53 = vpop.f32.mrf.mxu3 }
  0xcd   : > { %1874 = vst.msk [vmem:[%s2974_s7 + $0x108] sm:$0xf] %vm1807_vm1, %v1745_v48  ;;  %v1358_v56 = vmul.f32 %v2951_v34, %v1134_v52  ;;  %v1390_v57 = vmul.f32 %v2951_v34, %v1214_v53  ;;  %v977_v58 = vpop.f32.mrf.mxu0  ;;  %v1057_v59 = vpop.f32.mrf.mxu1 }
  0xce   : > { %1906 = vst.msk [vmem:[%s2974_s7 + $0x188] sm:$0xf] %vm1807_vm1, %v1777_v49  ;;  %v1295_v62 = vmul.f32 %v2951_v34, %v977_v58  ;;  %v1327_v63 = vmul.f32 %v2951_v34, %v1057_v59 }
  0xcf   : > { %1811 = vst.msk [vmem:[%s2974_s7 + $0xc] sm:$0xf] %vm1807_vm1, %v1682_v50  ;;  %v1490_v0 = vadd.f32 %v2956_v35, %v1358_v56  ;;  %v1522_v1 = vadd.f32 %v2956_v35, %v1390_v57 }
  0xd0   : > { %1843 = vst.msk [vmem:[%s2974_s7 + $0x8c] sm:$0xf] %vm1807_vm1, %v1714_v51  ;;  %v1427_v2 = vadd.f32 %v2956_v35, %v1295_v62  ;;  %v1459_v3 = vadd.f32 %v2956_v35, %v1327_v63  ;;  %2371 = vmatmul.msk.bf16.gmra.mxu0 %vm765_vm0, %v2441_v54  ;;  %2387 = vmatmul.msk.bf16.gmra.mxu1 %vm765_vm0, %v2457_v55 }
  0xd1   : > { %v1618_v4 = vmax.f32 %v1490_v0, 0.0  ;;  %v1650_v5 = vmax.f32 %v1522_v1, 0.0  ;;  %2403 = vmatmul.msk.bf16.gmra.mxu2 %vm765_vm0, %v2473_v60  ;;  %2419 = vmatmul.msk.bf16.gmra.mxu3 %vm765_vm0, %v2489_v61 }
  0xd2   : > { %v1555_v6 = vmax.f32 %v1427_v2, 0.0  ;;  %v1587_v7 = vmax.f32 %v1459_v3, 0.0 }
  0xd3   : > { %v1746_v8 = vpack.c.bf16 %v1618_v4, %v1618_v4  ;;  %v1778_v9 = vpack.c.bf16 %v1650_v5, %v1650_v5 }
  0xd4   : > { %v1683_v10 = vpack.c.bf16 %v1555_v6, %v1555_v6  ;;  %v1715_v11 = vpack.c.bf16 %v1587_v7, %v1587_v7  ;;  %v1137_v12 = vpop.f32.mrf.mxu2  ;;  %v1217_v13 = vpop.f32.mrf.mxu3 }
  0xd5   : > { %1875 = vst.msk [vmem:[%s2974_s7 + $0x10c] sm:$0xf] %vm1807_vm1, %v1746_v8  ;;  %v1359_v14 = vmul.f32 %v2951_v34, %v1137_v12  ;;  %v1391_v15 = vmul.f32 %v2951_v34, %v1217_v13  ;;  %v979_v16 = vpop.f32.mrf.mxu0  ;;  %v1059_v17 = vpop.f32.mrf.mxu1 }
  0xd6   : > { %1907 = vst.msk [vmem:[%s2974_s7 + $0x18c] sm:$0xf] %vm1807_vm1, %v1778_v9  ;;  %v1296_v18 = vmul.f32 %v2951_v34, %v979_v16  ;;  %v1328_v19 = vmul.f32 %v2951_v34, %v1059_v17  ;;  %v2443_v16 = vld [vmem:[%s2874_s11 + $0x60] sm:$0xff] }
  0xd7   : > { %1812 = vst.msk [vmem:[%s2974_s7 + $0x10] sm:$0xf] %vm1807_vm1, %v1683_v10  ;;  %v1491_v20 = vadd.f32 %v2956_v35, %v1359_v14  ;;  %v1523_v21 = vadd.f32 %v2956_v35, %v1391_v15  ;;  %v2459_v17 = vld [vmem:[%s2874_s11 + $0xe0] sm:$0xff] }
  0xd8   : > { %1844 = vst.msk [vmem:[%s2974_s7 + $0x90] sm:$0xf] %vm1807_vm1, %v1715_v11  ;;  %v1428_v22 = vadd.f32 %v2956_v35, %v1296_v18  ;;  %v1460_v23 = vadd.f32 %v2956_v35, %v1328_v19 }
  0xd9   : > { %v1619_v24 = vmax.f32 %v1491_v20, 0.0  ;;  %v1651_v25 = vmax.f32 %v1523_v21, 0.0 }
  0xda   : > { %v1556_v26 = vmax.f32 %v1428_v22, 0.0  ;;  %v1588_v27 = vmax.f32 %v1460_v23, 0.0  ;;  %v2475_v22 = vld [vmem:[%s2874_s11 + $0x160] sm:$0xff] }
  0xdb   : > { %v1747_v28 = vpack.c.bf16 %v1619_v24, %v1619_v24  ;;  %v1779_v29 = vpack.c.bf16 %v1651_v25, %v1651_v25  ;;  %v2491_v23 = vld [vmem:[%s2874_s11 + $0x1e0] sm:$0xff] }
  0xdc   : > { %v1684_v30 = vpack.c.bf16 %v1556_v26, %v1556_v26  ;;  %v1716_v31 = vpack.c.bf16 %v1588_v27, %v1588_v27  ;;  %v1139_v32 = vpop.f32.mrf.mxu2  ;;  %v1219_v33 = vpop.f32.mrf.mxu3 }
  0xdd   : > { %1876 = vst.msk [vmem:[%s2974_s7 + $0x110] sm:$0xf] %vm1807_vm1, %v1747_v28  ;;  %v1360_v38 = vmul.f32 %v2951_v34, %v1139_v32  ;;  %v1392_v39 = vmul.f32 %v2951_v34, %v1219_v33  ;;  %v982_v40 = vpop.f32.mrf.mxu0  ;;  %v1062_v41 = vpop.f32.mrf.mxu1 }
  0xde   : > { %1908 = vst.msk [vmem:[%s2974_s7 + $0x190] sm:$0xf] %vm1807_vm1, %v1779_v29  ;;  %v1297_v44 = vmul.f32 %v2951_v34, %v982_v40  ;;  %v1329_v45 = vmul.f32 %v2951_v34, %v1062_v41 }
  0xdf   : > { %1813 = vst.msk [vmem:[%s2974_s7 + $0x14] sm:$0xf] %vm1807_vm1, %v1684_v30  ;;  %v1492_v46 = vadd.f32 %v2956_v35, %v1360_v38  ;;  %v1524_v47 = vadd.f32 %v2956_v35, %v1392_v39 }
  0xe0   : > { %1845 = vst.msk [vmem:[%s2974_s7 + $0x94] sm:$0xf] %vm1807_vm1, %v1716_v31  ;;  %v1429_v48 = vadd.f32 %v2956_v35, %v1297_v44  ;;  %v1461_v49 = vadd.f32 %v2956_v35, %v1329_v45  ;;  %2372 = vmatmul.msk.bf16.gmra.mxu0 %vm765_vm0, %v2442_v36  ;;  %2388 = vmatmul.msk.bf16.gmra.mxu1 %vm765_vm0, %v2458_v37 }
  0xe1   : > { %v1620_v50 = vmax.f32 %v1492_v46, 0.0  ;;  %v1652_v51 = vmax.f32 %v1524_v47, 0.0  ;;  %2404 = vmatmul.msk.bf16.gmra.mxu2 %vm765_vm0, %v2474_v42  ;;  %2420 = vmatmul.msk.bf16.gmra.mxu3 %vm765_vm0, %v2490_v43 }
  0xe2   : > { %v1557_v52 = vmax.f32 %v1429_v48, 0.0  ;;  %v1589_v53 = vmax.f32 %v1461_v49, 0.0 }
  0xe3   : > { %v1748_v54 = vpack.c.bf16 %v1620_v50, %v1620_v50  ;;  %v1780_v55 = vpack.c.bf16 %v1652_v51, %v1652_v51 }
  0xe4   : > { %v1685_v56 = vpack.c.bf16 %v1557_v52, %v1557_v52  ;;  %v1717_v57 = vpack.c.bf16 %v1589_v53, %v1589_v53  ;;  %v1142_v58 = vpop.f32.mrf.mxu2  ;;  %v1222_v59 = vpop.f32.mrf.mxu3 }
  0xe5   : > { %1877 = vst.msk [vmem:[%s2974_s7 + $0x114] sm:$0xf] %vm1807_vm1, %v1748_v54  ;;  %v1361_v60 = vmul.f32 %v2951_v34, %v1142_v58  ;;  %v1393_v61 = vmul.f32 %v2951_v34, %v1222_v59  ;;  %v984_v62 = vpop.f32.mrf.mxu0  ;;  %v1064_v63 = vpop.f32.mrf.mxu1 }
  0xe6   : > { %1909 = vst.msk [vmem:[%s2974_s7 + $0x194] sm:$0xf] %vm1807_vm1, %v1780_v55  ;;  %v1298_v0 = vmul.f32 %v2951_v34, %v984_v62  ;;  %v1330_v1 = vmul.f32 %v2951_v34, %v1064_v63  ;;  %v2444_v62 = vld [vmem:[%s2874_s11 + $0x68] sm:$0xff] }
  0xe7   : > { %1814 = vst.msk [vmem:[%s2974_s7 + $0x18] sm:$0xf] %vm1807_vm1, %v1685_v56  ;;  %v1493_v2 = vadd.f32 %v2956_v35, %v1361_v60  ;;  %v1525_v3 = vadd.f32 %v2956_v35, %v1393_v61  ;;  %v2460_v63 = vld [vmem:[%s2874_s11 + $0xe8] sm:$0xff] }
  0xe8   : > { %1846 = vst.msk [vmem:[%s2974_s7 + $0x98] sm:$0xf] %vm1807_vm1, %v1717_v57  ;;  %v1430_v4 = vadd.f32 %v2956_v35, %v1298_v0  ;;  %v1462_v5 = vadd.f32 %v2956_v35, %v1330_v1 }
  0xe9   : > { %v1621_v6 = vmax.f32 %v1493_v2, 0.0  ;;  %v1653_v7 = vmax.f32 %v1525_v3, 0.0 }
  0xea   : > { %v1558_v8 = vmax.f32 %v1430_v4, 0.0  ;;  %v1590_v9 = vmax.f32 %v1462_v5, 0.0  ;;  %v2476_v4 = vld [vmem:[%s2874_s11 + $0x168] sm:$0xff] }
  0xeb   : > { %v1749_v10 = vpack.c.bf16 %v1621_v6, %v1621_v6  ;;  %v1781_v11 = vpack.c.bf16 %v1653_v7, %v1653_v7  ;;  %v2492_v5 = vld [vmem:[%s2874_s11 + $0x1e8] sm:$0xff] }
  0xec   : > { %v1686_v12 = vpack.c.bf16 %v1558_v8, %v1558_v8  ;;  %v1718_v13 = vpack.c.bf16 %v1590_v9, %v1590_v9  ;;  %v1144_v14 = vpop.f32.mrf.mxu2  ;;  %v1224_v15 = vpop.f32.mrf.mxu3 }
  0xed   : > { %1878 = vst.msk [vmem:[%s2974_s7 + $0x118] sm:$0xf] %vm1807_vm1, %v1749_v10  ;;  %v1362_v18 = vmul.f32 %v2951_v34, %v1144_v14  ;;  %v1394_v19 = vmul.f32 %v2951_v34, %v1224_v15  ;;  %v987_v20 = vpop.f32.mrf.mxu0  ;;  %v1067_v21 = vpop.f32.mrf.mxu1 }
  0xee   : > { %1910 = vst.msk [vmem:[%s2974_s7 + $0x198] sm:$0xf] %vm1807_vm1, %v1781_v11  ;;  %v1299_v24 = vmul.f32 %v2951_v34, %v987_v20  ;;  %v1331_v25 = vmul.f32 %v2951_v34, %v1067_v21 }
  0xef   : > { %1815 = vst.msk [vmem:[%s2974_s7 + $0x1c] sm:$0xf] %vm1807_vm1, %v1686_v12  ;;  %v1494_v26 = vadd.f32 %v2956_v35, %v1362_v18  ;;  %v1526_v27 = vadd.f32 %v2956_v35, %v1394_v19 }
  0xf0   : > { %1847 = vst.msk [vmem:[%s2974_s7 + $0x9c] sm:$0xf] %vm1807_vm1, %v1718_v13  ;;  %v1431_v28 = vadd.f32 %v2956_v35, %v1299_v24  ;;  %v1463_v29 = vadd.f32 %v2956_v35, %v1331_v25  ;;  %2373 = vmatmul.msk.bf16.gmra.mxu0 %vm765_vm0, %v2443_v16  ;;  %2389 = vmatmul.msk.bf16.gmra.mxu1 %vm765_vm0, %v2459_v17 }
  0xf1   : > { %v1622_v30 = vmax.f32 %v1494_v26, 0.0  ;;  %v1654_v31 = vmax.f32 %v1526_v27, 0.0  ;;  %2405 = vmatmul.msk.bf16.gmra.mxu2 %vm765_vm0, %v2475_v22  ;;  %2421 = vmatmul.msk.bf16.gmra.mxu3 %vm765_vm0, %v2491_v23 }
  0xf2   : > { %v1559_v32 = vmax.f32 %v1431_v28, 0.0  ;;  %v1591_v33 = vmax.f32 %v1463_v29, 0.0 }
  0xf3   : > { %v1750_v36 = vpack.c.bf16 %v1622_v30, %v1622_v30  ;;  %v1782_v37 = vpack.c.bf16 %v1654_v31, %v1654_v31 }
  0xf4   : > { %v1687_v38 = vpack.c.bf16 %v1559_v32, %v1559_v32  ;;  %v1719_v39 = vpack.c.bf16 %v1591_v33, %v1591_v33  ;;  %v1147_v40 = vpop.f32.mrf.mxu2  ;;  %v1227_v41 = vpop.f32.mrf.mxu3 }
  0xf5   : > { %1879 = vst.msk [vmem:[%s2974_s7 + $0x11c] sm:$0xf] %vm1807_vm1, %v1750_v36  ;;  %v1363_v42 = vmul.f32 %v2951_v34, %v1147_v40  ;;  %v1395_v43 = vmul.f32 %v2951_v34, %v1227_v41  ;;  %v989_v44 = vpop.f32.mrf.mxu0  ;;  %v1069_v45 = vpop.f32.mrf.mxu1 }
  0xf6   : > { %1911 = vst.msk [vmem:[%s2974_s7 + $0x19c] sm:$0xf] %vm1807_vm1, %v1782_v37  ;;  %v1300_v46 = vmul.f32 %v2951_v34, %v989_v44  ;;  %v1332_v47 = vmul.f32 %v2951_v34, %v1069_v45  ;;  %v2445_v44 = vld [vmem:[%s2874_s11 + $0x70] sm:$0xff] }
  0xf7   : > { %1816 = vst.msk [vmem:[%s2974_s7 + $0x20] sm:$0xf] %vm1807_vm1, %v1687_v38  ;;  %v1495_v48 = vadd.f32 %v2956_v35, %v1363_v42  ;;  %v1527_v49 = vadd.f32 %v2956_v35, %v1395_v43  ;;  %v2461_v45 = vld [vmem:[%s2874_s11 + $0xf0] sm:$0xff] }
  0xf8   : > { %1848 = vst.msk [vmem:[%s2974_s7 + $0xa0] sm:$0xf] %vm1807_vm1, %v1719_v39  ;;  %v1432_v50 = vadd.f32 %v2956_v35, %v1300_v46  ;;  %v1464_v51 = vadd.f32 %v2956_v35, %v1332_v47 }
  0xf9   : > { %v1623_v52 = vmax.f32 %v1495_v48, 0.0  ;;  %v1655_v53 = vmax.f32 %v1527_v49, 0.0 }
  0xfa   : > { %v1560_v54 = vmax.f32 %v1432_v50, 0.0  ;;  %v1592_v55 = vmax.f32 %v1464_v51, 0.0  ;;  %v2477_v50 = vld [vmem:[%s2874_s11 + $0x170] sm:$0xff] }
  0xfb   : > { %v1751_v56 = vpack.c.bf16 %v1623_v52, %v1623_v52  ;;  %v1783_v57 = vpack.c.bf16 %v1655_v53, %v1655_v53  ;;  %v2493_v51 = vld [vmem:[%s2874_s11 + $0x1f0] sm:$0xff] }
  0xfc   : > { %v1688_v58 = vpack.c.bf16 %v1560_v54, %v1560_v54  ;;  %v1720_v59 = vpack.c.bf16 %v1592_v55, %v1592_v55  ;;  %v1149_v60 = vpop.f32.mrf.mxu2  ;;  %v1229_v61 = vpop.f32.mrf.mxu3 }
  0xfd   : > { %1880 = vst.msk [vmem:[%s2974_s7 + $0x120] sm:$0xf] %vm1807_vm1, %v1751_v56  ;;  %v1364_v0 = vmul.f32 %v2951_v34, %v1149_v60  ;;  %v1396_v1 = vmul.f32 %v2951_v34, %v1229_v61  ;;  %v992_v2 = vpop.f32.mrf.mxu0  ;;  %v1072_v3 = vpop.f32.mrf.mxu1 }
  0xfe   : > { %1912 = vst.msk [vmem:[%s2974_s7 + $0x1a0] sm:$0xf] %vm1807_vm1, %v1783_v57  ;;  %v1301_v6 = vmul.f32 %v2951_v34, %v992_v2  ;;  %v1333_v7 = vmul.f32 %v2951_v34, %v1072_v3 }
  0xff   : > { %1817 = vst.msk [vmem:[%s2974_s7 + $0x24] sm:$0xf] %vm1807_vm1, %v1688_v58  ;;  %v1496_v8 = vadd.f32 %v2956_v35, %v1364_v0  ;;  %v1528_v9 = vadd.f32 %v2956_v35, %v1396_v1 }
 0x100   : > { %1849 = vst.msk [vmem:[%s2974_s7 + $0xa4] sm:$0xf] %vm1807_vm1, %v1720_v59  ;;  %v1433_v10 = vadd.f32 %v2956_v35, %v1301_v6  ;;  %v1465_v11 = vadd.f32 %v2956_v35, %v1333_v7  ;;  %2374 = vmatmul.msk.bf16.gmra.mxu0 %vm765_vm0, %v2444_v62  ;;  %2390 = vmatmul.msk.bf16.gmra.mxu1 %vm765_vm0, %v2460_v63 }
 0x101   : > { %v1624_v12 = vmax.f32 %v1496_v8, 0.0  ;;  %v1656_v13 = vmax.f32 %v1528_v9, 0.0  ;;  %2406 = vmatmul.msk.bf16.gmra.mxu2 %vm765_vm0, %v2476_v4  ;;  %2422 = vmatmul.msk.bf16.gmra.mxu3 %vm765_vm0, %v2492_v5 }
 0x102   : > { %v1561_v14 = vmax.f32 %v1433_v10, 0.0  ;;  %v1593_v15 = vmax.f32 %v1465_v11, 0.0 }
 0x103   : > { %v1752_v16 = vpack.c.bf16 %v1624_v12, %v1624_v12  ;;  %v1784_v17 = vpack.c.bf16 %v1656_v13, %v1656_v13 }
 0x104   : > { %v1689_v18 = vpack.c.bf16 %v1561_v14, %v1561_v14  ;;  %v1721_v19 = vpack.c.bf16 %v1593_v15, %v1593_v15  ;;  %v1152_v20 = vpop.f32.mrf.mxu2  ;;  %v1232_v21 = vpop.f32.mrf.mxu3 }
 0x105   : > { %1881 = vst.msk [vmem:[%s2974_s7 + $0x124] sm:$0xf] %vm1807_vm1, %v1752_v16  ;;  %v1365_v22 = vmul.f32 %v2951_v34, %v1152_v20  ;;  %v1397_v23 = vmul.f32 %v2951_v34, %v1232_v21  ;;  %v994_v24 = vpop.f32.mrf.mxu0  ;;  %v1074_v25 = vpop.f32.mrf.mxu1 }
 0x106   : > { %1913 = vst.msk [vmem:[%s2974_s7 + $0x1a4] sm:$0xf] %vm1807_vm1, %v1784_v17  ;;  %v1302_v26 = vmul.f32 %v2951_v34, %v994_v24  ;;  %v1334_v27 = vmul.f32 %v2951_v34, %v1074_v25  ;;  %v2446_v24 = vld [vmem:[%s2874_s11 + $0x78] sm:$0xff] }
 0x107   : > { %1818 = vst.msk [vmem:[%s2974_s7 + $0x28] sm:$0xf] %vm1807_vm1, %v1689_v18  ;;  %v1497_v28 = vadd.f32 %v2956_v35, %v1365_v22  ;;  %v1529_v29 = vadd.f32 %v2956_v35, %v1397_v23  ;;  %v2462_v25 = vld [vmem:[%s2874_s11 + $0xf8] sm:$0xff] }
 0x108   : > { %1850 = vst.msk [vmem:[%s2974_s7 + $0xa8] sm:$0xf] %vm1807_vm1, %v1721_v19  ;;  %v1434_v30 = vadd.f32 %v2956_v35, %v1302_v26  ;;  %v1466_v31 = vadd.f32 %v2956_v35, %v1334_v27 }
 0x109   : > { %v1625_v32 = vmax.f32 %v1497_v28, 0.0  ;;  %v1657_v33 = vmax.f32 %v1529_v29, 0.0 }
 0x10a   : > { %v1562_v36 = vmax.f32 %v1434_v30, 0.0  ;;  %v1594_v37 = vmax.f32 %v1466_v31, 0.0  ;;  %v2478_v30 = vld [vmem:[%s2874_s11 + $0x178] sm:$0xff] }
 0x10b   : > { %v1753_v38 = vpack.c.bf16 %v1625_v32, %v1625_v32  ;;  %v1785_v39 = vpack.c.bf16 %v1657_v33, %v1657_v33  ;;  %v2494_v31 = vld [vmem:[%s2874_s11 + $0x1f8] sm:$0xff]  ;;  %s2661_s11 = scalar_lea.hbm %s2660_s21, 512 }
 0x10c   : > { %v1690_v40 = vpack.c.bf16 %v1562_v36, %v1562_v36  ;;  %v1722_v41 = vpack.c.bf16 %v1594_v37, %v1594_v37  ;;  %v1154_v42 = vpop.f32.mrf.mxu2  ;;  %v1234_v43 = vpop.f32.mrf.mxu3  ;;  %p2662_p1 = scmp.ne.s32.totalorder %s2660_s21, %s2661_s11  ;;  %p2667_p12 = scmp.lt.s32.totalorder %s2665_s25, %s2661_s11 }
 0x10d   : > { %1882 = vst.msk [vmem:[%s2974_s7 + $0x128] sm:$0xf] %vm1807_vm1, %v1753_v38  ;;  %v1366_v46 = vmul.f32 %v2951_v34, %v1154_v42  ;;  %v1398_v47 = vmul.f32 %v2951_v34, %v1234_v43  ;;  %v997_v48 = vpop.f32.mrf.mxu0  ;;  %v1077_v49 = vpop.f32.mrf.mxu1 }
 0x10e   : > { %1914 = vst.msk [vmem:[%s2974_s7 + $0x1a8] sm:$0xf] %vm1807_vm1, %v1785_v39  ;;  %v1303_v52 = vmul.f32 %v2951_v34, %v997_v48  ;;  %v1335_v53 = vmul.f32 %v2951_v34, %v1077_v49  ;;  %p2663_p4 = pnand %p2662_p1, %p2845_p5  ;;  %p2668_p13 = por %p2667_p12, %p2666_p10 }
 0x10f   : > { %1819 = vst.msk [vmem:[%s2974_s7 + $0x2c] sm:$0xf] %vm1807_vm1, %v1690_v40  ;;  %v1498_v54 = vadd.f32 %v2956_v35, %v1366_v46  ;;  %v1530_v55 = vadd.f32 %v2956_v35, %v1398_v47 }
 0x110   : > { %1851 = vst.msk [vmem:[%s2974_s7 + $0xac] sm:$0xf] %vm1807_vm1, %v1722_v41  ;;  %v1435_v56 = vadd.f32 %v2956_v35, %v1303_v52  ;;  %v1467_v57 = vadd.f32 %v2956_v35, %v1335_v53  ;;  %2375 = vmatmul.msk.bf16.gmra.mxu0 %vm765_vm0, %v2445_v44  ;;  %2391 = vmatmul.msk.bf16.gmra.mxu1 %vm765_vm0, %v2461_v45  ;;  %p2664_p8 = pneg %p2663_p4 }
 0x111   : > { %v1626_v58 = vmax.f32 %v1498_v54, 0.0  ;;  %v1658_v59 = vmax.f32 %v1530_v55, 0.0  ;;  %2407 = vmatmul.msk.bf16.gmra.mxu2 %vm765_vm0, %v2477_v50  ;;  %2423 = vmatmul.msk.bf16.gmra.mxu3 %vm765_vm0, %v2493_v51 }
 0x112   : > { %v1563_v60 = vmax.f32 %v1435_v56, 0.0  ;;  %v1595_v61 = vmax.f32 %v1467_v57, 0.0  ;;  %p2669_p0 = pnand %p2668_p13, %p2664_p8 }
 0x113   : > { %v1754_v62 = vpack.c.bf16 %v1626_v58, %v1626_v58  ;;  %v1786_v63 = vpack.c.bf16 %v1658_v59, %v1658_v59 }
 0x114   : > { %v1691_v0 = vpack.c.bf16 %v1563_v60, %v1563_v60  ;;  %v1723_v1 = vpack.c.bf16 %v1595_v61, %v1595_v61  ;;  %v1157_v2 = vpop.f32.mrf.mxu2  ;;  %v1237_v3 = vpop.f32.mrf.mxu3 }
 0x115   : > { %1883 = vst.msk [vmem:[%s2974_s7 + $0x12c] sm:$0xf] %vm1807_vm1, %v1754_v62  ;;  %v1367_v4 = vmul.f32 %v2951_v34, %v1157_v2  ;;  %v1399_v5 = vmul.f32 %v2951_v34, %v1237_v3  ;;  %v999_v6 = vpop.f32.mrf.mxu0  ;;  %v1079_v7 = vpop.f32.mrf.mxu1 }
 0x116   : > { %1915 = vst.msk [vmem:[%s2974_s7 + $0x1ac] sm:$0xf] %vm1807_vm1, %v1786_v63  ;;  %v1304_v8 = vmul.f32 %v2951_v34, %v999_v6  ;;  %v1336_v9 = vmul.f32 %v2951_v34, %v1079_v7 }
 0x117   : > { %1820 = vst.msk [vmem:[%s2974_s7 + $0x30] sm:$0xf] %vm1807_vm1, %v1691_v0  ;;  %v1499_v10 = vadd.f32 %v2956_v35, %v1367_v4  ;;  %v1531_v11 = vadd.f32 %v2956_v35, %v1399_v5 }
 0x118   : > { %1852 = vst.msk [vmem:[%s2974_s7 + $0xb0] sm:$0xf] %vm1807_vm1, %v1723_v1  ;;  %v1436_v12 = vadd.f32 %v2956_v35, %v1304_v8  ;;  %v1468_v13 = vadd.f32 %v2956_v35, %v1336_v9 }
 0x119   : > { %v1627_v14 = vmax.f32 %v1499_v10, 0.0  ;;  %v1659_v15 = vmax.f32 %v1531_v11, 0.0 }
 0x11a   : > { %v1564_v16 = vmax.f32 %v1436_v12, 0.0  ;;  %v1596_v17 = vmax.f32 %v1468_v13, 0.0 }
 0x11b   : > { %v1755_v18 = vpack.c.bf16 %v1627_v14, %v1627_v14  ;;  %v1787_v19 = vpack.c.bf16 %v1659_v15, %v1659_v15 }
 0x11c   : > { %v1692_v20 = vpack.c.bf16 %v1564_v16, %v1564_v16  ;;  %v1724_v21 = vpack.c.bf16 %v1596_v17, %v1596_v17  ;;  %v1159_v22 = vpop.f32.mrf.mxu2  ;;  %v1239_v23 = vpop.f32.mrf.mxu3 }
 0x11d   : > { %1884 = vst.msk [vmem:[%s2974_s7 + $0x130] sm:$0xf] %vm1807_vm1, %v1755_v18  ;;  %v1368_v26 = vmul.f32 %v2951_v34, %v1159_v22  ;;  %v1400_v27 = vmul.f32 %v2951_v34, %v1239_v23  ;;  %v1002_v28 = vpop.f32.mrf.mxu0  ;;  %v1082_v29 = vpop.f32.mrf.mxu1 }
 0x11e   : > { %1916 = vst.msk [vmem:[%s2974_s7 + $0x1b0] sm:$0xf] %vm1807_vm1, %v1787_v19  ;;  %v1305_v32 = vmul.f32 %v2951_v34, %v1002_v28  ;;  %v1337_v33 = vmul.f32 %v2951_v34, %v1082_v29 }
 0x11f   : > { %1821 = vst.msk [vmem:[%s2974_s7 + $0x34] sm:$0xf] %vm1807_vm1, %v1692_v20  ;;  %v1500_v36 = vadd.f32 %v2956_v35, %v1368_v26  ;;  %v1532_v37 = vadd.f32 %v2956_v35, %v1400_v27 }
 0x120   : > { %1853 = vst.msk [vmem:[%s2974_s7 + $0xb4] sm:$0xf] %vm1807_vm1, %v1724_v21  ;;  %v1437_v38 = vadd.f32 %v2956_v35, %v1305_v32  ;;  %v1469_v39 = vadd.f32 %v2956_v35, %v1337_v33  ;;  %2376 = vmatmul.msk.bf16.gmra.mxu0 %vm765_vm0, %v2446_v24  ;;  %2392 = vmatmul.msk.bf16.gmra.mxu1 %vm765_vm0, %v2462_v25 }
 0x121   : > { %v1628_v40 = vmax.f32 %v1500_v36, 0.0  ;;  %v1660_v41 = vmax.f32 %v1532_v37, 0.0  ;;  %2408 = vmatmul.msk.bf16.gmra.mxu2 %vm765_vm0, %v2478_v30  ;;  %2424 = vmatmul.msk.bf16.gmra.mxu3 %vm765_vm0, %v2494_v31 }
 0x122   : > { %v1565_v42 = vmax.f32 %v1437_v38, 0.0  ;;  %v1597_v43 = vmax.f32 %v1469_v39, 0.0 }
 0x123   : > { %v1756_v44 = vpack.c.bf16 %v1628_v40, %v1628_v40  ;;  %v1788_v45 = vpack.c.bf16 %v1660_v41, %v1660_v41 }
 0x124   : > { %v1693_v46 = vpack.c.bf16 %v1565_v42, %v1565_v42  ;;  %v1725_v47 = vpack.c.bf16 %v1597_v43, %v1597_v43  ;;  %v1162_v48 = vpop.f32.mrf.mxu2  ;;  %v1242_v49 = vpop.f32.mrf.mxu3 }
 0x125   : > { %1885 = vst.msk [vmem:[%s2974_s7 + $0x134] sm:$0xf] %vm1807_vm1, %v1756_v44  ;;  %v1369_v50 = vmul.f32 %v2951_v34, %v1162_v48  ;;  %v1401_v51 = vmul.f32 %v2951_v34, %v1242_v49  ;;  %v1004_v52 = vpop.f32.mrf.mxu0  ;;  %v1084_v53 = vpop.f32.mrf.mxu1 }
 0x126   : > { %1917 = vst.msk [vmem:[%s2974_s7 + $0x1b4] sm:$0xf] %vm1807_vm1, %v1788_v45  ;;  %v1306_v54 = vmul.f32 %v2951_v34, %v1004_v52  ;;  %v1338_v55 = vmul.f32 %v2951_v34, %v1084_v53 }
 0x127   : > { %1822 = vst.msk [vmem:[%s2974_s7 + $0x38] sm:$0xf] %vm1807_vm1, %v1693_v46  ;;  %v1501_v56 = vadd.f32 %v2956_v35, %v1369_v50  ;;  %v1533_v57 = vadd.f32 %v2956_v35, %v1401_v51 }
 0x128   : > { %1854 = vst.msk [vmem:[%s2974_s7 + $0xb8] sm:$0xf] %vm1807_vm1, %v1725_v47  ;;  %v1438_v58 = vadd.f32 %v2956_v35, %v1306_v54  ;;  %v1470_v59 = vadd.f32 %v2956_v35, %v1338_v55 }
 0x129   : > { %v1629_v60 = vmax.f32 %v1501_v56, 0.0  ;;  %v1661_v61 = vmax.f32 %v1533_v57, 0.0 }
 0x12a   : > { %v1566_v62 = vmax.f32 %v1438_v58, 0.0  ;;  %v1598_v63 = vmax.f32 %v1470_v59, 0.0 }
 0x12b   : > { %v1757_v0 = vpack.c.bf16 %v1629_v60, %v1629_v60  ;;  %v1789_v1 = vpack.c.bf16 %v1661_v61, %v1661_v61 }
 0x12c   : > { %v1694_v2 = vpack.c.bf16 %v1566_v62, %v1566_v62  ;;  %v1726_v3 = vpack.c.bf16 %v1598_v63, %v1598_v63  ;;  %v1164_v4 = vpop.f32.mrf.mxu2  ;;  %v1244_v5 = vpop.f32.mrf.mxu3 }
 0x12d   : > { %1886 = vst.msk [vmem:[%s2974_s7 + $0x138] sm:$0xf] %vm1807_vm1, %v1757_v0  ;;  %v1370_v6 = vmul.f32 %v2951_v34, %v1164_v4  ;;  %v1402_v7 = vmul.f32 %v2951_v34, %v1244_v5  ;;  %v1007_v8 = vpop.f32.mrf.mxu0  ;;  %v1087_v9 = vpop.f32.mrf.mxu1 }
 0x12e   : > { %1918 = vst.msk [vmem:[%s2974_s7 + $0x1b8] sm:$0xf] %vm1807_vm1, %v1789_v1  ;;  %v1307_v10 = vmul.f32 %v2951_v34, %v1007_v8  ;;  %v1339_v11 = vmul.f32 %v2951_v34, %v1087_v9 }
 0x12f   : > { %1823 = vst.msk [vmem:[%s2974_s7 + $0x3c] sm:$0xf] %vm1807_vm1, %v1694_v2  ;;  %v1502_v12 = vadd.f32 %v2956_v35, %v1370_v6  ;;  %v1534_v13 = vadd.f32 %v2956_v35, %v1402_v7 }
 0x130   : > { %1855 = vst.msk [vmem:[%s2974_s7 + $0xbc] sm:$0xf] %vm1807_vm1, %v1726_v3  ;;  %v1439_v14 = vadd.f32 %v2956_v35, %v1307_v10  ;;  %v1471_v15 = vadd.f32 %v2956_v35, %v1339_v11 }
 0x131   : > { %v1630_v16 = vmax.f32 %v1502_v12, 0.0  ;;  %v1662_v17 = vmax.f32 %v1534_v13, 0.0 }
 0x132   : > { %v1567_v18 = vmax.f32 %v1439_v14, 0.0  ;;  %v1599_v19 = vmax.f32 %v1471_v15, 0.0 }
 0x133   : > { %v1758_v20 = vpack.c.bf16 %v1630_v16, %v1630_v16  ;;  %v1790_v21 = vpack.c.bf16 %v1662_v17, %v1662_v17 }
 0x134   : > { %v1695_v22 = vpack.c.bf16 %v1567_v18, %v1567_v18  ;;  %v1727_v23 = vpack.c.bf16 %v1599_v19, %v1599_v19  ;;  %v1167_v24 = vpop.f32.mrf.mxu2  ;;  %v1247_v25 = vpop.f32.mrf.mxu3 }
 0x135   : > { %1887 = vst.msk [vmem:[%s2974_s7 + $0x13c] sm:$0xf] %vm1807_vm1, %v1758_v20  ;;  %v1371_v26 = vmul.f32 %v2951_v34, %v1167_v24  ;;  %v1403_v27 = vmul.f32 %v2951_v34, %v1247_v25  ;;  %v1009_v28 = vpop.f32.mrf.mxu0  ;;  %v1089_v29 = vpop.f32.mrf.mxu1 }
 0x136   : > { %1919 = vst.msk [vmem:[%s2974_s7 + $0x1bc] sm:$0xf] %vm1807_vm1, %v1790_v21  ;;  %v1308_v30 = vmul.f32 %v2951_v34, %v1009_v28  ;;  %v1340_v31 = vmul.f32 %v2951_v34, %v1089_v29 }
 0x137   : > { %1824 = vst.msk [vmem:[%s2974_s7 + $0x40] sm:$0xf] %vm1807_vm1, %v1695_v22  ;;  %v1503_v32 = vadd.f32 %v2956_v35, %v1371_v26  ;;  %v1535_v33 = vadd.f32 %v2956_v35, %v1403_v27 }
 0x138   : > { %1856 = vst.msk [vmem:[%s2974_s7 + $0xc0] sm:$0xf] %vm1807_vm1, %v1727_v23  ;;  %v1440_v36 = vadd.f32 %v2956_v35, %v1308_v30  ;;  %v1472_v37 = vadd.f32 %v2956_v35, %v1340_v31 }
 0x139   : > { %v1631_v38 = vmax.f32 %v1503_v32, 0.0  ;;  %v1663_v39 = vmax.f32 %v1535_v33, 0.0 }
 0x13a   : > { %v1568_v40 = vmax.f32 %v1440_v36, 0.0  ;;  %v1600_v41 = vmax.f32 %v1472_v37, 0.0 }
 0x13b   : > { %v1759_v42 = vpack.c.bf16 %v1631_v38, %v1631_v38  ;;  %v1791_v43 = vpack.c.bf16 %v1663_v39, %v1663_v39 }
 0x13c   : > { %v1696_v44 = vpack.c.bf16 %v1568_v40, %v1568_v40  ;;  %v1728_v45 = vpack.c.bf16 %v1600_v41, %v1600_v41  ;;  %v1169_v46 = vpop.f32.mrf.mxu2  ;;  %v1249_v47 = vpop.f32.mrf.mxu3 }
 0x13d   : > { %1888 = vst.msk [vmem:[%s2974_s7 + $0x140] sm:$0xf] %vm1807_vm1, %v1759_v42  ;;  %v1372_v48 = vmul.f32 %v2951_v34, %v1169_v46  ;;  %v1404_v49 = vmul.f32 %v2951_v34, %v1249_v47  ;;  %v1012_v50 = vpop.f32.mrf.mxu0  ;;  %v1092_v51 = vpop.f32.mrf.mxu1 }
 0x13e   : > { %1920 = vst.msk [vmem:[%s2974_s7 + $0x1c0] sm:$0xf] %vm1807_vm1, %v1791_v43  ;;  %v1309_v52 = vmul.f32 %v2951_v34, %v1012_v50  ;;  %v1341_v53 = vmul.f32 %v2951_v34, %v1092_v51 }
 0x13f   : > { %1825 = vst.msk [vmem:[%s2974_s7 + $0x44] sm:$0xf] %vm1807_vm1, %v1696_v44  ;;  %v1504_v54 = vadd.f32 %v2956_v35, %v1372_v48  ;;  %v1536_v55 = vadd.f32 %v2956_v35, %v1404_v49 }
 0x140   : > { %1857 = vst.msk [vmem:[%s2974_s7 + $0xc4] sm:$0xf] %vm1807_vm1, %v1728_v45  ;;  %v1441_v56 = vadd.f32 %v2956_v35, %v1309_v52  ;;  %v1473_v57 = vadd.f32 %v2956_v35, %v1341_v53  ;;  %v3320_v35 = vld [vmem:[%s3589_s2] ss:$0 sm:$0xff] }
 0x141   : > { %v1632_v58 = vmax.f32 %v1504_v54, 0.0  ;;  %v1664_v59 = vmax.f32 %v1536_v55, 0.0 }
 0x142   : > { %v1569_v60 = vmax.f32 %v1441_v56, 0.0  ;;  %v1601_v61 = vmax.f32 %v1473_v57, 0.0 }
 0x143   : > { %v1760_v62 = vpack.c.bf16 %v1632_v58, %v1632_v58  ;;  %v1792_v63 = vpack.c.bf16 %v1664_v59, %v1664_v59 }
 0x144   : > { %v1697_v0 = vpack.c.bf16 %v1569_v60, %v1569_v60  ;;  %v1729_v1 = vpack.c.bf16 %v1601_v61, %v1601_v61  ;;  %v1172_v2 = vpop.f32.mrf.mxu2  ;;  %v1252_v3 = vpop.f32.mrf.mxu3 }
 0x145   : > { %1889 = vst.msk [vmem:[%s2974_s7 + $0x144] sm:$0xf] %vm1807_vm1, %v1760_v62  ;;  %v1373_v4 = vmul.f32 %v2951_v34, %v1172_v2  ;;  %v1405_v5 = vmul.f32 %v3320_v35, %v1252_v3  ;;  %v1014_v6 = vpop.f32.mrf.mxu0  ;;  %v1094_v7 = vpop.f32.mrf.mxu1  ;;  %v3332_v34 = vld [vmem:[%s3590_s3] ss:$0 sm:$0xff] }
 0x146   : > { %1921 = vst.msk [vmem:[%s2974_s7 + $0x1c4] sm:$0xf] %vm1807_vm1, %v1792_v63  ;;  %v1310_v8 = vmul.f32 %v3320_v35, %v1014_v6  ;;  %v1342_v9 = vmul.f32 %v3320_v35, %v1094_v7 }
 0x147   : > { %1826 = vst.msk [vmem:[%s2974_s7 + $0x48] sm:$0xf] %vm1807_vm1, %v1697_v0  ;;  %v1505_v10 = vadd.f32 %v3332_v34, %v1373_v4  ;;  %v1537_v11 = vadd.f32 %v3332_v34, %v1405_v5 }
 0x148   : > { %1858 = vst.msk [vmem:[%s2974_s7 + $0xc8] sm:$0xf] %vm1807_vm1, %v1729_v1  ;;  %v1442_v12 = vadd.f32 %v3332_v34, %v1310_v8  ;;  %v1474_v13 = vadd.f32 %v3332_v34, %v1342_v9 }
 0x149   : > { %v1633_v14 = vmax.f32 %v1505_v10, 0.0  ;;  %v1665_v15 = vmax.f32 %v1537_v11, 0.0 }
 0x14a   : > { %v1570_v16 = vmax.f32 %v1442_v12, 0.0  ;;  %v1602_v17 = vmax.f32 %v1474_v13, 0.0 }
 0x14b   : > { %v1761_v18 = vpack.c.bf16 %v1633_v14, %v1633_v14  ;;  %v1793_v19 = vpack.c.bf16 %v1665_v15, %v1665_v15 }
 0x14c   : > { %v1698_v20 = vpack.c.bf16 %v1570_v16, %v1570_v16  ;;  %v1730_v21 = vpack.c.bf16 %v1602_v17, %v1602_v17  ;;  %v1174_v22 = vpop.f32.mrf.mxu2  ;;  %v1254_v23 = vpop.f32.mrf.mxu3 }
 0x14d   : > { %1890 = vst.msk [vmem:[%s2974_s7 + $0x148] sm:$0xf] %vm1807_vm1, %v1761_v18  ;;  %v1374_v24 = vmul.f32 %v3320_v35, %v1174_v22  ;;  %v1406_v25 = vmul.f32 %v3320_v35, %v1254_v23  ;;  %v1017_v26 = vpop.f32.mrf.mxu0  ;;  %v1097_v27 = vpop.f32.mrf.mxu1 }
 0x14e   : > { %1922 = vst.msk [vmem:[%s2974_s7 + $0x1c8] sm:$0xf] %vm1807_vm1, %v1793_v19  ;;  %v1311_v28 = vmul.f32 %v3320_v35, %v1017_v26  ;;  %v1343_v29 = vmul.f32 %v3320_v35, %v1097_v27 }
 0x14f   : > { %1827 = vst.msk [vmem:[%s2974_s7 + $0x4c] sm:$0xf] %vm1807_vm1, %v1698_v20  ;;  %v1506_v30 = vadd.f32 %v3332_v34, %v1374_v24  ;;  %v1538_v31 = vadd.f32 %v3332_v34, %v1406_v25 }
 0x150   : > { %1859 = vst.msk [vmem:[%s2974_s7 + $0xcc] sm:$0xf] %vm1807_vm1, %v1730_v21  ;;  %v1443_v32 = vadd.f32 %v3332_v34, %v1311_v28  ;;  %v1475_v33 = vadd.f32 %v3332_v34, %v1343_v29 }
 0x151   : > { %v1634_v36 = vmax.f32 %v1506_v30, 0.0  ;;  %v1666_v37 = vmax.f32 %v1538_v31, 0.0 }
 0x152   : > { %v1571_v38 = vmax.f32 %v1443_v32, 0.0  ;;  %v1603_v39 = vmax.f32 %v1475_v33, 0.0 }
 0x153   : > { %v1762_v40 = vpack.c.bf16 %v1634_v36, %v1634_v36  ;;  %v1794_v41 = vpack.c.bf16 %v1666_v37, %v1666_v37 }
 0x154   : > { %v1699_v42 = vpack.c.bf16 %v1571_v38, %v1571_v38  ;;  %v1731_v43 = vpack.c.bf16 %v1603_v39, %v1603_v39  ;;  %v1177_v44 = vpop.f32.mrf.mxu2  ;;  %v1257_v45 = vpop.f32.mrf.mxu3 }
 0x155   : > { %1891 = vst.msk [vmem:[%s2974_s7 + $0x14c] sm:$0xf] %vm1807_vm1, %v1762_v40  ;;  %v1375_v46 = vmul.f32 %v3320_v35, %v1177_v44  ;;  %v1407_v47 = vmul.f32 %v3320_v35, %v1257_v45  ;;  %v1019_v48 = vpop.f32.mrf.mxu0  ;;  %v1099_v49 = vpop.f32.mrf.mxu1 }
 0x156   : > { %1923 = vst.msk [vmem:[%s2974_s7 + $0x1cc] sm:$0xf] %vm1807_vm1, %v1794_v41  ;;  %v1312_v50 = vmul.f32 %v3320_v35, %v1019_v48  ;;  %v1344_v51 = vmul.f32 %v3320_v35, %v1099_v49 }
 0x157   : > { %1828 = vst.msk [vmem:[%s2974_s7 + $0x50] sm:$0xf] %vm1807_vm1, %v1699_v42  ;;  %v1507_v52 = vadd.f32 %v3332_v34, %v1375_v46  ;;  %v1539_v53 = vadd.f32 %v3332_v34, %v1407_v47 }
 0x158   : > { %1860 = vst.msk [vmem:[%s2974_s7 + $0xd0] sm:$0xf] %vm1807_vm1, %v1731_v43  ;;  %v1444_v54 = vadd.f32 %v3332_v34, %v1312_v50  ;;  %v1476_v55 = vadd.f32 %v3332_v34, %v1344_v51 }
 0x159   : > { %v1635_v56 = vmax.f32 %v1507_v52, 0.0  ;;  %v1667_v57 = vmax.f32 %v1539_v53, 0.0 }
 0x15a   : > { %v1572_v58 = vmax.f32 %v1444_v54, 0.0  ;;  %v1604_v59 = vmax.f32 %v1476_v55, 0.0 }
 0x15b   : > { %v1763_v60 = vpack.c.bf16 %v1635_v56, %v1635_v56  ;;  %v1795_v61 = vpack.c.bf16 %v1667_v57, %v1667_v57 }
 0x15c   : > { %v1700_v62 = vpack.c.bf16 %v1572_v58, %v1572_v58  ;;  %v1732_v63 = vpack.c.bf16 %v1604_v59, %v1604_v59  ;;  %v1179_v0 = vpop.f32.mrf.mxu2  ;;  %v1259_v1 = vpop.f32.mrf.mxu3 }
 0x15d   : > { %1892 = vst.msk [vmem:[%s2974_s7 + $0x150] sm:$0xf] %vm1807_vm1, %v1763_v60  ;;  %v1376_v2 = vmul.f32 %v3320_v35, %v1179_v0  ;;  %v1408_v3 = vmul.f32 %v3320_v35, %v1259_v1  ;;  %v1022_v4 = vpop.f32.mrf.mxu0  ;;  %v1102_v5 = vpop.f32.mrf.mxu1 }
 0x15e   : > { %1924 = vst.msk [vmem:[%s2974_s7 + $0x1d0] sm:$0xf] %vm1807_vm1, %v1795_v61  ;;  %v1313_v6 = vmul.f32 %v3320_v35, %v1022_v4  ;;  %v1345_v7 = vmul.f32 %v3320_v35, %v1102_v5 }
 0x15f   : > { %1829 = vst.msk [vmem:[%s2974_s7 + $0x54] sm:$0xf] %vm1807_vm1, %v1700_v62  ;;  %v1508_v8 = vadd.f32 %v3332_v34, %v1376_v2  ;;  %v1540_v9 = vadd.f32 %v3332_v34, %v1408_v3 }
 0x160   : > { %1861 = vst.msk [vmem:[%s2974_s7 + $0xd4] sm:$0xf] %vm1807_vm1, %v1732_v63  ;;  %v1445_v10 = vadd.f32 %v3332_v34, %v1313_v6  ;;  %v1477_v11 = vadd.f32 %v3332_v34, %v1345_v7 }
 0x161   : > { %v1636_v12 = vmax.f32 %v1508_v8, 0.0  ;;  %v1668_v13 = vmax.f32 %v1540_v9, 0.0 }
 0x162   : > { %v1573_v14 = vmax.f32 %v1445_v10, 0.0  ;;  %v1605_v15 = vmax.f32 %v1477_v11, 0.0 }
 0x163   : > { %v1764_v16 = vpack.c.bf16 %v1636_v12, %v1636_v12  ;;  %v1796_v17 = vpack.c.bf16 %v1668_v13, %v1668_v13 }
 0x164   : > { %v1701_v18 = vpack.c.bf16 %v1573_v14, %v1573_v14  ;;  %v1733_v19 = vpack.c.bf16 %v1605_v15, %v1605_v15  ;;  %v1182_v20 = vpop.f32.mrf.mxu2  ;;  %v1262_v21 = vpop.f32.mrf.mxu3 }
 0x165   : > { %1893 = vst.msk [vmem:[%s2974_s7 + $0x154] sm:$0xf] %vm1807_vm1, %v1764_v16  ;;  %v1377_v22 = vmul.f32 %v3320_v35, %v1182_v20  ;;  %v1409_v23 = vmul.f32 %v3320_v35, %v1262_v21  ;;  %v1024_v24 = vpop.f32.mrf.mxu0  ;;  %v1104_v25 = vpop.f32.mrf.mxu1 }
 0x166   : > { %1925 = vst.msk [vmem:[%s2974_s7 + $0x1d4] sm:$0xf] %vm1807_vm1, %v1796_v17  ;;  %v1314_v26 = vmul.f32 %v3320_v35, %v1024_v24  ;;  %v1346_v27 = vmul.f32 %v3320_v35, %v1104_v25 }
 0x167   : > { %1830 = vst.msk [vmem:[%s2974_s7 + $0x58] sm:$0xf] %vm1807_vm1, %v1701_v18  ;;  %v1509_v28 = vadd.f32 %v3332_v34, %v1377_v22  ;;  %v1541_v29 = vadd.f32 %v3332_v34, %v1409_v23 }
 0x168   : > { %1862 = vst.msk [vmem:[%s2974_s7 + $0xd8] sm:$0xf] %vm1807_vm1, %v1733_v19  ;;  %v1446_v30 = vadd.f32 %v3332_v34, %v1314_v26  ;;  %v1478_v31 = vadd.f32 %v3332_v34, %v1346_v27 }
 0x169   : > { %v1637_v32 = vmax.f32 %v1509_v28, 0.0  ;;  %v1669_v33 = vmax.f32 %v1541_v29, 0.0 }
 0x16a   : > { %v1574_v36 = vmax.f32 %v1446_v30, 0.0  ;;  %v1606_v37 = vmax.f32 %v1478_v31, 0.0 }
 0x16b   : > { %v1765_v38 = vpack.c.bf16 %v1637_v32, %v1637_v32  ;;  %v1797_v39 = vpack.c.bf16 %v1669_v33, %v1669_v33 }
 0x16c   : > { %v1702_v40 = vpack.c.bf16 %v1574_v36, %v1574_v36  ;;  %v1734_v41 = vpack.c.bf16 %v1606_v37, %v1606_v37  ;;  %v1184_v42 = vpop.f32.mrf.mxu2  ;;  %v1264_v43 = vpop.f32.mrf.mxu3 }
 0x16d   : > { %1894 = vst.msk [vmem:[%s2974_s7 + $0x158] sm:$0xf] %vm1807_vm1, %v1765_v38  ;;  %v1378_v44 = vmul.f32 %v3320_v35, %v1184_v42  ;;  %v1410_v45 = vmul.f32 %v3320_v35, %v1264_v43  ;;  %v1027_v46 = vpop.f32.mrf.mxu0  ;;  %v1107_v47 = vpop.f32.mrf.mxu1 }
 0x16e   : > { %1926 = vst.msk [vmem:[%s2974_s7 + $0x1d8] sm:$0xf] %vm1807_vm1, %v1797_v39  ;;  %v1315_v48 = vmul.f32 %v3320_v35, %v1027_v46  ;;  %v1347_v49 = vmul.f32 %v3320_v35, %v1107_v47 }
 0x16f   : > { %1831 = vst.msk [vmem:[%s2974_s7 + $0x5c] sm:$0xf] %vm1807_vm1, %v1702_v40  ;;  %v1510_v50 = vadd.f32 %v3332_v34, %v1378_v44  ;;  %v1542_v51 = vadd.f32 %v3332_v34, %v1410_v45 }
 0x170   : > { %1863 = vst.msk [vmem:[%s2974_s7 + $0xdc] sm:$0xf] %vm1807_vm1, %v1734_v41  ;;  %v1447_v52 = vadd.f32 %v3332_v34, %v1315_v48  ;;  %v1479_v53 = vadd.f32 %v3332_v34, %v1347_v49 }
 0x171   : > { %v1638_v54 = vmax.f32 %v1510_v50, 0.0  ;;  %v1670_v55 = vmax.f32 %v1542_v51, 0.0 }
 0x172   : > { %v1575_v56 = vmax.f32 %v1447_v52, 0.0  ;;  %v1607_v57 = vmax.f32 %v1479_v53, 0.0 }
 0x173   : > { %v1766_v58 = vpack.c.bf16 %v1638_v54, %v1638_v54  ;;  %v1798_v59 = vpack.c.bf16 %v1670_v55, %v1670_v55 }
 0x174   : > { %v1703_v60 = vpack.c.bf16 %v1575_v56, %v1575_v56  ;;  %v1735_v61 = vpack.c.bf16 %v1607_v57, %v1607_v57  ;;  %v1187_v62 = vpop.f32.mrf.mxu2  ;;  %v1267_v63 = vpop.f32.mrf.mxu3 }
 0x175   : > { %1895 = vst.msk [vmem:[%s2974_s7 + $0x15c] sm:$0xf] %vm1807_vm1, %v1766_v58  ;;  %v1379_v0 = vmul.f32 %v3320_v35, %v1187_v62  ;;  %v1411_v1 = vmul.f32 %v3320_v35, %v1267_v63  ;;  %v1029_v2 = vpop.f32.mrf.mxu0  ;;  %v1109_v3 = vpop.f32.mrf.mxu1 }
 0x176   : > { %1927 = vst.msk [vmem:[%s2974_s7 + $0x1dc] sm:$0xf] %vm1807_vm1, %v1798_v59  ;;  %v1316_v4 = vmul.f32 %v3320_v35, %v1029_v2  ;;  %v1348_v5 = vmul.f32 %v3320_v35, %v1109_v3 }
 0x177   : > { %1832 = vst.msk [vmem:[%s2974_s7 + $0x60] sm:$0xf] %vm1807_vm1, %v1703_v60  ;;  %v1511_v6 = vadd.f32 %v3332_v34, %v1379_v0  ;;  %v1543_v7 = vadd.f32 %v3332_v34, %v1411_v1 }
 0x178   : > { %1864 = vst.msk [vmem:[%s2974_s7 + $0xe0] sm:$0xf] %vm1807_vm1, %v1735_v61  ;;  %v1448_v8 = vadd.f32 %v3332_v34, %v1316_v4  ;;  %v1480_v9 = vadd.f32 %v3332_v34, %v1348_v5 }
 0x179   : > { %v1639_v10 = vmax.f32 %v1511_v6, 0.0  ;;  %v1671_v11 = vmax.f32 %v1543_v7, 0.0 }
 0x17a   : > { %v1576_v12 = vmax.f32 %v1448_v8, 0.0  ;;  %v1608_v13 = vmax.f32 %v1480_v9, 0.0 }
 0x17b   : > { %v1767_v14 = vpack.c.bf16 %v1639_v10, %v1639_v10  ;;  %v1799_v15 = vpack.c.bf16 %v1671_v11, %v1671_v11 }
 0x17c   : > { %v1704_v16 = vpack.c.bf16 %v1576_v12, %v1576_v12  ;;  %v1736_v17 = vpack.c.bf16 %v1608_v13, %v1608_v13  ;;  %v1189_v18 = vpop.f32.mrf.mxu2  ;;  %v1269_v19 = vpop.f32.mrf.mxu3 }
 0x17d   : > { %1896 = vst.msk [vmem:[%s2974_s7 + $0x160] sm:$0xf] %vm1807_vm1, %v1767_v14  ;;  %v1380_v20 = vmul.f32 %v3320_v35, %v1189_v18  ;;  %v1412_v21 = vmul.f32 %v3320_v35, %v1269_v19  ;;  %v1032_v22 = vpop.f32.mrf.mxu0  ;;  %v1112_v23 = vpop.f32.mrf.mxu1 }
 0x17e   : > { %1928 = vst.msk [vmem:[%s2974_s7 + $0x1e0] sm:$0xf] %vm1807_vm1, %v1799_v15  ;;  %v1317_v24 = vmul.f32 %v3320_v35, %v1032_v22  ;;  %v1349_v25 = vmul.f32 %v3320_v35, %v1112_v23 }
 0x17f   : > { %1833 = vst.msk [vmem:[%s2974_s7 + $0x64] sm:$0xf] %vm1807_vm1, %v1704_v16  ;;  %v1512_v26 = vadd.f32 %v3332_v34, %v1380_v20  ;;  %v1544_v27 = vadd.f32 %v3332_v34, %v1412_v21 }
 0x180   : > { %1865 = vst.msk [vmem:[%s2974_s7 + $0xe4] sm:$0xf] %vm1807_vm1, %v1736_v17  ;;  %v1449_v28 = vadd.f32 %v3332_v34, %v1317_v24  ;;  %v1481_v29 = vadd.f32 %v3332_v34, %v1349_v25 }
 0x181   : > { %v1640_v30 = vmax.f32 %v1512_v26, 0.0  ;;  %v1672_v31 = vmax.f32 %v1544_v27, 0.0 }
 0x182   : > { %v1577_v32 = vmax.f32 %v1449_v28, 0.0  ;;  %v1609_v33 = vmax.f32 %v1481_v29, 0.0 }
 0x183   : > { %v1768_v36 = vpack.c.bf16 %v1640_v30, %v1640_v30  ;;  %v1800_v37 = vpack.c.bf16 %v1672_v31, %v1672_v31 }
 0x184   : > { %v1705_v38 = vpack.c.bf16 %v1577_v32, %v1577_v32  ;;  %v1737_v39 = vpack.c.bf16 %v1609_v33, %v1609_v33  ;;  %v1192_v40 = vpop.f32.mrf.mxu2  ;;  %v1272_v41 = vpop.f32.mrf.mxu3 }
 0x185   : > { %1897 = vst.msk [vmem:[%s2974_s7 + $0x164] sm:$0xf] %vm1807_vm1, %v1768_v36  ;;  %v1381_v42 = vmul.f32 %v3320_v35, %v1192_v40  ;;  %v1413_v43 = vmul.f32 %v3320_v35, %v1272_v41  ;;  %v1034_v44 = vpop.f32.mrf.mxu0  ;;  %v1114_v45 = vpop.f32.mrf.mxu1 }
 0x186   : > { %1929 = vst.msk [vmem:[%s2974_s7 + $0x1e4] sm:$0xf] %vm1807_vm1, %v1800_v37  ;;  %v1318_v46 = vmul.f32 %v3320_v35, %v1034_v44  ;;  %v1350_v47 = vmul.f32 %v3320_v35, %v1114_v45 }
 0x187   : > { %1834 = vst.msk [vmem:[%s2974_s7 + $0x68] sm:$0xf] %vm1807_vm1, %v1705_v38  ;;  %v1513_v48 = vadd.f32 %v3332_v34, %v1381_v42  ;;  %v1545_v49 = vadd.f32 %v3332_v34, %v1413_v43 }
 0x188   : > { %1866 = vst.msk [vmem:[%s2974_s7 + $0xe8] sm:$0xf] %vm1807_vm1, %v1737_v39  ;;  %v1450_v50 = vadd.f32 %v3332_v34, %v1318_v46  ;;  %v1482_v51 = vadd.f32 %v3332_v34, %v1350_v47 }
 0x189   : > { %v1641_v52 = vmax.f32 %v1513_v48, 0.0  ;;  %v1673_v53 = vmax.f32 %v1545_v49, 0.0 }
 0x18a   : > { %v1578_v54 = vmax.f32 %v1450_v50, 0.0  ;;  %v1610_v55 = vmax.f32 %v1482_v51, 0.0 }
 0x18b   : > { %v1769_v56 = vpack.c.bf16 %v1641_v52, %v1641_v52  ;;  %v1801_v57 = vpack.c.bf16 %v1673_v53, %v1673_v53 }
 0x18c   : > { %v1706_v58 = vpack.c.bf16 %v1578_v54, %v1578_v54  ;;  %v1738_v59 = vpack.c.bf16 %v1610_v55, %v1610_v55  ;;  %v1194_v60 = vpop.f32.mrf.mxu2  ;;  %v1274_v61 = vpop.f32.mrf.mxu3 }
 0x18d   : > { %1898 = vst.msk [vmem:[%s2974_s7 + $0x168] sm:$0xf] %vm1807_vm1, %v1769_v56  ;;  %v1382_v62 = vmul.f32 %v3320_v35, %v1194_v60  ;;  %v1414_v63 = vmul.f32 %v3320_v35, %v1274_v61  ;;  %v1037_v0 = vpop.f32.mrf.mxu0  ;;  %v1117_v1 = vpop.f32.mrf.mxu1 }
 0x18e   : > { %1930 = vst.msk [vmem:[%s2974_s7 + $0x1e8] sm:$0xf] %vm1807_vm1, %v1801_v57  ;;  %v1319_v2 = vmul.f32 %v3320_v35, %v1037_v0  ;;  %v1351_v3 = vmul.f32 %v3320_v35, %v1117_v1 }
 0x18f   : > { %1835 = vst.msk [vmem:[%s2974_s7 + $0x6c] sm:$0xf] %vm1807_vm1, %v1706_v58  ;;  %v1514_v4 = vadd.f32 %v3332_v34, %v1382_v62  ;;  %v1546_v5 = vadd.f32 %v3332_v34, %v1414_v63 }
 0x190   : > { %1867 = vst.msk [vmem:[%s2974_s7 + $0xec] sm:$0xf] %vm1807_vm1, %v1738_v59  ;;  %v1451_v6 = vadd.f32 %v3332_v34, %v1319_v2  ;;  %v1483_v7 = vadd.f32 %v3332_v34, %v1351_v3 }
 0x191   : > { %v1642_v8 = vmax.f32 %v1514_v4, 0.0  ;;  %v1674_v9 = vmax.f32 %v1546_v5, 0.0 }
 0x192   : > { %v1579_v10 = vmax.f32 %v1451_v6, 0.0  ;;  %v1611_v11 = vmax.f32 %v1483_v7, 0.0 }
 0x193   : > { %v1770_v12 = vpack.c.bf16 %v1642_v8, %v1642_v8  ;;  %v1802_v13 = vpack.c.bf16 %v1674_v9, %v1674_v9 }
 0x194   : > { %v1707_v14 = vpack.c.bf16 %v1579_v10, %v1579_v10  ;;  %v1739_v15 = vpack.c.bf16 %v1611_v11, %v1611_v11  ;;  %v1197_v16 = vpop.f32.mrf.mxu2  ;;  %v1277_v17 = vpop.f32.mrf.mxu3 }
 0x195   : > { %1899 = vst.msk [vmem:[%s2974_s7 + $0x16c] sm:$0xf] %vm1807_vm1, %v1770_v12  ;;  %v1383_v18 = vmul.f32 %v3320_v35, %v1197_v16  ;;  %v1415_v19 = vmul.f32 %v3320_v35, %v1277_v17  ;;  %v1039_v20 = vpop.f32.mrf.mxu0  ;;  %v1119_v21 = vpop.f32.mrf.mxu1 }
 0x196   : > { %1931 = vst.msk [vmem:[%s2974_s7 + $0x1ec] sm:$0xf] %vm1807_vm1, %v1802_v13  ;;  %v1320_v22 = vmul.f32 %v3320_v35, %v1039_v20  ;;  %v1352_v23 = vmul.f32 %v3320_v35, %v1119_v21 }
 0x197   : > { %1836 = vst.msk [vmem:[%s2974_s7 + $0x70] sm:$0xf] %vm1807_vm1, %v1707_v14  ;;  %v1515_v24 = vadd.f32 %v3332_v34, %v1383_v18  ;;  %v1547_v25 = vadd.f32 %v3332_v34, %v1415_v19 }
 0x198   : > { %1868 = vst.msk [vmem:[%s2974_s7 + $0xf0] sm:$0xf] %vm1807_vm1, %v1739_v15  ;;  %v1452_v26 = vadd.f32 %v3332_v34, %v1320_v22  ;;  %v1484_v27 = vadd.f32 %v3332_v34, %v1352_v23 }
 0x199   : > { %v1643_v28 = vmax.f32 %v1515_v24, 0.0  ;;  %v1675_v29 = vmax.f32 %v1547_v25, 0.0 }
 0x19a   : > { %v1580_v30 = vmax.f32 %v1452_v26, 0.0  ;;  %v1612_v31 = vmax.f32 %v1484_v27, 0.0 }
 0x19b   : > { %v1771_v32 = vpack.c.bf16 %v1643_v28, %v1643_v28  ;;  %v1803_v33 = vpack.c.bf16 %v1675_v29, %v1675_v29 }
 0x19c   : > { %v1708_v36 = vpack.c.bf16 %v1580_v30, %v1580_v30  ;;  %v1740_v37 = vpack.c.bf16 %v1612_v31, %v1612_v31  ;;  %v1199_v38 = vpop.f32.mrf.mxu2  ;;  %v1279_v39 = vpop.f32.mrf.mxu3 }
 0x19d   : > { %1900 = vst.msk [vmem:[%s2974_s7 + $0x170] sm:$0xf] %vm1807_vm1, %v1771_v32  ;;  %v1384_v40 = vmul.f32 %v3320_v35, %v1199_v38  ;;  %v1416_v41 = vmul.f32 %v3320_v35, %v1279_v39  ;;  %v1042_v42 = vpop.f32.mrf.mxu0  ;;  %v1122_v43 = vpop.f32.mrf.mxu1 }
 0x19e   : > { %1932 = vst.msk [vmem:[%s2974_s7 + $0x1f0] sm:$0xf] %vm1807_vm1, %v1803_v33  ;;  %v1321_v44 = vmul.f32 %v3320_v35, %v1042_v42  ;;  %v1353_v45 = vmul.f32 %v3320_v35, %v1122_v43 }
 0x19f   : > { %1837 = vst.msk [vmem:[%s2974_s7 + $0x74] sm:$0xf] %vm1807_vm1, %v1708_v36  ;;  %v1516_v46 = vadd.f32 %v3332_v34, %v1384_v40  ;;  %v1548_v47 = vadd.f32 %v3332_v34, %v1416_v41 }
 0x1a0   : > { %1869 = vst.msk [vmem:[%s2974_s7 + $0xf4] sm:$0xf] %vm1807_vm1, %v1740_v37  ;;  %v1453_v48 = vadd.f32 %v3332_v34, %v1321_v44  ;;  %v1485_v49 = vadd.f32 %v3332_v34, %v1353_v45 }
 0x1a1   : > { %v1644_v50 = vmax.f32 %v1516_v46, 0.0  ;;  %v1676_v51 = vmax.f32 %v1548_v47, 0.0 }
 0x1a2   : > { %v1581_v52 = vmax.f32 %v1453_v48, 0.0  ;;  %v1613_v53 = vmax.f32 %v1485_v49, 0.0 }
 0x1a3   : > { %v1772_v54 = vpack.c.bf16 %v1644_v50, %v1644_v50  ;;  %v1804_v55 = vpack.c.bf16 %v1676_v51, %v1676_v51 }
 0x1a4   : > { %v1709_v56 = vpack.c.bf16 %v1581_v52, %v1581_v52  ;;  %v1741_v57 = vpack.c.bf16 %v1613_v53, %v1613_v53  ;;  %v1202_v58 = vpop.f32.mrf.mxu2  ;;  %v1282_v59 = vpop.f32.mrf.mxu3 }
 0x1a5   : > { %1901 = vst.msk [vmem:[%s2974_s7 + $0x174] sm:$0xf] %vm1807_vm1, %v1772_v54  ;;  %v1385_v60 = vmul.f32 %v3320_v35, %v1202_v58  ;;  %v1417_v61 = vmul.f32 %v3320_v35, %v1282_v59  ;;  %v1044_v62 = vpop.f32.mrf.mxu0  ;;  %v1124_v63 = vpop.f32.mrf.mxu1 }
 0x1a6   : > { %1933 = vst.msk [vmem:[%s2974_s7 + $0x1f4] sm:$0xf] %vm1807_vm1, %v1804_v55  ;;  %v1322_v0 = vmul.f32 %v3320_v35, %v1044_v62  ;;  %v1354_v1 = vmul.f32 %v3320_v35, %v1124_v63 }
 0x1a7   : > { %1838 = vst.msk [vmem:[%s2974_s7 + $0x78] sm:$0xf] %vm1807_vm1, %v1709_v56  ;;  %v1517_v2 = vadd.f32 %v3332_v34, %v1385_v60  ;;  %v1549_v3 = vadd.f32 %v3332_v34, %v1417_v61 }
 0x1a8   : > { %1870 = vst.msk [vmem:[%s2974_s7 + $0xf8] sm:$0xf] %vm1807_vm1, %v1741_v57  ;;  %v1454_v4 = vadd.f32 %v3332_v34, %v1322_v0  ;;  %v1486_v5 = vadd.f32 %v3332_v34, %v1354_v1 }
 0x1a9   : > { %v1645_v6 = vmax.f32 %v1517_v2, 0.0  ;;  %v1677_v7 = vmax.f32 %v1549_v3, 0.0 }
 0x1aa   : > { %v1582_v8 = vmax.f32 %v1454_v4, 0.0  ;;  %v1614_v9 = vmax.f32 %v1486_v5, 0.0 }
 0x1ab   : > { %v1773_v10 = vpack.c.bf16 %v1645_v6, %v1645_v6  ;;  %v1805_v11 = vpack.c.bf16 %v1677_v7, %v1677_v7 }
 0x1ac   : > { %v1710_v12 = vpack.c.bf16 %v1582_v8, %v1582_v8  ;;  %v1742_v13 = vpack.c.bf16 %v1614_v9, %v1614_v9  ;;  %v1204_v14 = vpop.f32.mrf.mxu2  ;;  %v1284_v15 = vpop.f32.mrf.mxu3 }
 0x1ad   : > { %1902 = vst.msk [vmem:[%s2974_s7 + $0x178] sm:$0xf] %vm1807_vm1, %v1773_v10  ;;  %v1386_v16 = vmul.f32 %v3320_v35, %v1204_v14  ;;  %v1418_v17 = vmul.f32 %v3320_v35, %v1284_v15 }
 0x1ae   : > { %1934 = vst.msk [vmem:[%s2974_s7 + $0x1f8] sm:$0xf] %vm1807_vm1, %v1805_v11 }
 0x1af   : > { %1839 = vst.msk [vmem:[%s2974_s7 + $0x7c] sm:$0xf] %vm1807_vm1, %v1710_v12  ;;  %v1518_v18 = vadd.f32 %v3332_v34, %v1386_v16  ;;  %v1550_v19 = vadd.f32 %v3332_v34, %v1418_v17 }
 0x1b0   : > { %1871 = vst.msk [vmem:[%s2974_s7 + $0xfc] sm:$0xf] %vm1807_vm1, %v1742_v13 }
 0x1b1   : > { %v1646_v35 = vmax.f32 %v1518_v18, 0.0  ;;  %v1678_v20 = vmax.f32 %v1550_v19, 0.0 }
 0x1b3   : > { %v1774_v21 = vpack.c.bf16 %v1646_v35, %v1646_v35  ;;  %v1806_v22 = vpack.c.bf16 %v1678_v20, %v1678_v20 }
 0x1b5   : > { %1903 = vst.msk [vmem:[%s2974_s7 + $0x17c] sm:$0xf] %vm1807_vm1, %v1774_v21 }
 0x1b6   : > { %1935 = vst.msk [vmem:[%s2974_s7 + $0x1fc] sm:$0xf] %vm1807_vm1, %v1806_v22 }
 0x1b7   : > { %2672 = shalt.err (!%p2669_p0)
}
 0x1b8   : > { %s2736_s10 = smov 64   ;;  %s2737_s7 = smov 4  }
 0x1b9   : > { %2510 = dma.vmem_to_hbm [thread:$0]  (%p2845_p5), %s1954_s18, 8192, %s1956_s24, %s1937_s13, %s2736_s10, %s2736_s10, %s2737_s7  }
 0x1ba PF: > { %s1970_s9 = sand.u32 1, %s2711_s15   ;;  %p2521_p3 = pnand %p2089_p11, %p2812_p6 }
 0x1bb   : > { %s1971_s14 = scalar_lea.sflag [#allocation4], %s1970_s9 }
 0x1bc   : > { %p2522_p7 = pneg %p2521_p3 }
 0x1be   : > { %2706 = dma.done.wait (%p2522_p7), %s1971_s14, 8192  }
 0x1bf   : > { %2708 = vsyncadd (%p2522_p7), %s1971_s14, 4294959104  ;;  %s21_s20 = sadd.s32 1, %s2731_s20   ;;  %s3607_s12 = sld [smem:[#allocation11_spill]] }
 0x1c0   : > { %p18_p9 = scmp.ge.s32.totalorder %s21_s20, 4   ;;  %s3608_s15 = smov %s2715_s16 }
 0x1c1   : > { %s3609_s16 = smov %s2719_s17  ;;  %s3610_s17 = smov %s2854_s22 }
 0x1c2   : > { %s3611_s18 = smov %s2727_s19  ;;  %20 = sbr.rel (!%p18_p9) target bundleno = 9 (0x9), region = 92 }
 0x1c5   : > { %s3612_s19 = smov %s3607_s12 }
 0x1c7   :  { %1977 = vsyncpa [#allocation3], 1 }
 0x1c8   :  { %1979 = vsyncpa [#allocation3 + $0x1], 1 }
 0x1c9   :  { %1980 = vsyncpa [#allocation6], 1 }
 0x1ca   :  { %1981 = vsyncpa [#allocation4], 1 }
 0x1cb   :  { %1983 = vsyncpa [#allocation4 + $0x1], 1 }

</bundles_post_ra>
